<compile_context>
chip_gen: v7x
topology: tpu7x:2x2x1
jax: 0.10.0
libtpu: 0.0.40
codegen_flags: <defaults>
</compile_context>

<pallas_src>
import functools

import jax
import jax.numpy as jnp
from jax.experimental import pallas as pl
from jax.experimental.pallas import tpu as pltpu


LANE = 128                     # TPU lane width; all last dims padded to this.
NODE_TILE = 256                # TM (row tile) and node-dim padding multiple.
FUSED_MAX_NODES = 2048         # single fused kernel up to this padded node count.
VMEM_LIMIT = 48 * 1024 * 1024  # <= v7x 64 MiB physical VMEM per TensorCore.


def _round_up(x, m):
    return (x + m - 1) // m * m


def _pad2d(a, rows, cols):
    return jnp.pad(a, ((0, rows - a.shape[0]), (0, cols - a.shape[1])))


def _pick_tk(np_):
    """Largest reduction tile that divides the (256-multiple) padded node count."""
    for cand in (2048, 1024, 512, 256):
        if np_ % cand == 0:
            return cand
    return 256


def _masked_log_softmax(logits_f32, num_valid):
    """Row-wise log_softmax over the first `num_valid` columns (rest are padding)."""
    col = jax.lax.broadcasted_iota(jnp.int32, logits_f32.shape, 1)
    valid = col < num_valid
    x = jnp.where(valid, logits_f32, jnp.float32(-1e30))  # f32 only; never bf16.
    m = jnp.max(x, axis=1, keepdims=True)
    e = jnp.where(valid, jnp.exp(x - m), 0.0)
    lse = jnp.log(jnp.sum(e, axis=1, keepdims=True))
    return x - m - lse


# ----------------------------- Pallas kernels ------------------------------

def _gcn_fused_kernel(a_ref, x_ref, w1_ref, b1_ref, w2_ref, b2_ref, o_ref,
                      *, num_classes):
    """Whole GCN forward for a small/medium (padded) graph, resident in VMEM."""
    a = a_ref[...]                                   # [Np, Np] bf16

    # Layer 1: A @ (X @ W1) + b1, ReLU.
    xw = jnp.dot(x_ref[...], w1_ref[...], preferred_element_type=jnp.float32)
    h = jnp.dot(a, xw.astype(jnp.bfloat16),
                preferred_element_type=jnp.float32) + b1_ref[...]
    h = jnp.maximum(h, 0.0)
    # F.dropout(..., training=self.training): identity in eval mode.
    # TODO(synk): pltpu.prng_random_bits-based dropout for training=True.

    # Layer 2: A @ (H @ W2) + b2, fused masked log_softmax.
    hw2 = jnp.dot(h.astype(jnp.bfloat16), w2_ref[...],
                  preferred_element_type=jnp.float32)
    logits = jnp.dot(a, hw2.astype(jnp.bfloat16),
                     preferred_element_type=jnp.float32) + b2_ref[...]
    o_ref[...] = _masked_log_softmax(logits, num_classes).astype(o_ref.dtype)


def _matmul_rows_kernel(x_ref, w_ref, o_ref):
    """One-shot row-tiled X @ W (the hoisted XW1 precompute)."""
    o_ref[...] = jnp.dot(x_ref[...], w_ref[...],
                         preferred_element_type=jnp.float32).astype(o_ref.dtype)


def _agg_layer1_kernel(a_ref, xw_ref, b1_ref, w2_ref, o_ref, acc_ref, *, tk):
    """Layer 1 aggregation: acc += A_tile @ XW1_rows; finalize = relu(+b1) @ W2."""
    k = pl.program_id(1)

    @pl.when(k == 0)
    def _():
        acc_ref[...] = jnp.zeros_like(acc_ref)

    start = pl.multiple_of(k * tk, tk)
    acc_ref[...] += jnp.dot(a_ref[...], xw_ref[pl.ds(start, tk), :],
                            preferred_element_type=jnp.float32)

    @pl.when(k == pl.num_programs(1) - 1)
    def _():
        h = jnp.maximum(acc_ref[...] + b1_ref[...], 0.0)
        # Dropout is identity in eval mode.
        hw2 = jnp.dot(h.astype(jnp.bfloat16), w2_ref[...],
                      preferred_element_type=jnp.float32)
        o_ref[...] = hw2.astype(o_ref.dtype)


def _agg_layer2_kernel(a_ref, hw2_ref, b2_ref, o_ref, acc_ref,
                       *, tk, num_classes):
    """Layer 2 aggregation: acc += A_tile @ HW2_rows; finalize = +b2, log_softmax."""
    k = pl.program_id(1)

    @pl.when(k == 0)
    def _():
        acc_ref[...] = jnp.zeros_like(acc_ref)

    start = pl.multiple_of(k * tk, tk)
    acc_ref[...] += jnp.dot(a_ref[...], hw2_ref[pl.ds(start, tk), :],
                            preferred_element_type=jnp.float32)

    @pl.when(k == pl.num_programs(1) - 1)
    def _():
        logits = acc_ref[...] + b2_ref[...]
        o_ref[...] = _masked_log_softmax(logits, num_classes).astype(o_ref.dtype)


# ------------------------------ wrappers ------------------------------------

def _gcn_fused(a_p, x_p, w1_p, b1_p, w2_p, b2_p, num_classes):
    np_, _ = a_p.shape
    cp = w2_p.shape[1]
    kernel = functools.partial(_gcn_fused_kernel, num_classes=num_classes)
    return pl.pallas_call(
        kernel,
        out_shape=jax.ShapeDtypeStruct((np_, cp), jnp.float32),
        grid=(1,),
        in_specs=[
            pl.BlockSpec(a_p.shape, lambda i: (0, 0)),
            pl.BlockSpec(x_p.shape, lambda i: (0, 0)),
            pl.BlockSpec(w1_p.shape, lambda i: (0, 0)),
            pl.BlockSpec(b1_p.shape, lambda i: (0, 0)),
            pl.BlockSpec(w2_p.shape, lambda i: (0, 0)),
            pl.BlockSpec(b2_p.shape, lambda i: (0, 0)),
        ],
        out_specs=pl.BlockSpec((np_, cp), lambda i: (0, 0)),
        compiler_params=pltpu.CompilerParams(
            dimension_semantics=("arbitrary",),
            vmem_limit_bytes=VMEM_LIMIT,
        ),
    )(a_p, x_p, w1_p, b1_p, w2_p, b2_p)


def _matmul_rows(x_p, w_p, *, tm):
    np_, f_in = x_p.shape
    f_out = w_p.shape[1]
    return pl.pallas_call(
        _matmul_rows_kernel,
        out_shape=jax.ShapeDtypeStruct((np_, f_out), jnp.bfloat16),
        grid=(np_ // tm,),
        in_specs=[
            pl.BlockSpec((tm, f_in), lambda i: (i, 0)),
            pl.BlockSpec((f_in, f_out), lambda i: (0, 0)),
        ],
        out_specs=pl.BlockSpec((tm, f_out), lambda i: (i, 0)),
        compiler_params=pltpu.CompilerParams(
            dimension_semantics=("parallel",),
            vmem_limit_bytes=VMEM_LIMIT,
        ),
    )(x_p, w_p)


def _gcn_agg_layer1(a_p, xw_p, b1_p, w2_p, *, tm, tk):
    np_ = a_p.shape[0]
    hp = xw_p.shape[1]
    cp = w2_p.shape[1]
    kernel = functools.partial(_agg_layer1_kernel, tk=tk)
    return pl.pallas_call(
        kernel,
        out_shape=jax.ShapeDtypeStruct((np_, cp), jnp.bfloat16),
        grid=(np_ // tm, np_ // tk),
        in_specs=[
            pl.BlockSpec((tm, tk), lambda i, k: (i, k)),      # A_hat tile (streamed)
            pl.BlockSpec((np_, hp), lambda i, k: (0, 0)),     # XW1 fully VMEM-resident
            pl.BlockSpec((1, hp), lambda i, k: (0, 0)),       # b1
            pl.BlockSpec((hp, cp), lambda i, k: (0, 0)),      # W2 resident (finalize)
        ],
        out_specs=pl.BlockSpec((tm, cp), lambda i, k: (i, 0)),
        scratch_shapes=[pltpu.VMEM((tm, hp), jnp.float32)],
        compiler_params=pltpu.CompilerParams(
            dimension_semantics=("parallel", "arbitrary"),
            vmem_limit_bytes=VMEM_LIMIT,
        ),
    )(a_p, xw_p, b1_p, w2_p)


def _gcn_agg_layer2(a_p, hw2_p, b2_p, *, tm, tk, num_classes):
    np_ = a_p.shape[0]
    cp = hw2_p.shape[1]
    kernel = functools.partial(_agg_layer2_kernel, tk=tk, num_classes=num_classes)
    return pl.pallas_call(
        kernel,
        out_shape=jax.ShapeDtypeStruct((np_, cp), jnp.float32),
        grid=(np_ // tm, np_ // tk),
        in_specs=[
            pl.BlockSpec((tm, tk), lambda i, k: (i, k)),      # A_hat tile (streamed)
            pl.BlockSpec((np_, cp), lambda i, k: (0, 0)),     # HW2 fully VMEM-resident
            pl.BlockSpec((1, cp), lambda i, k: (0, 0)),       # b2
        ],
        out_specs=pl.BlockSpec((tm, cp), lambda i, k: (i, 0)),
        scratch_shapes=[pltpu.VMEM((tm, cp), jnp.float32)],
        compiler_params=pltpu.CompilerParams(
            dimension_semantics=("parallel", "arbitrary"),
            vmem_limit_bytes=VMEM_LIMIT,
        ),
    )(a_p, hw2_p, b2_p)


def build_normalized_adjacency(edge_index, num_nodes):
    """Dense A_hat = D^-1/2 (A + I) D^-1/2 from edge_index [2, E] (src, dst).

    Note: duplicate edges collapse to 1.0 (binary adjacency); PyG's scatter-add
    would count multiplicity in the degree for multigraphs.
    """
    src, dst = edge_index[0], edge_index[1]
    a = jnp.zeros((num_nodes, num_nodes), dtype=jnp.float32)
    a = a.at[dst, src].set(1.0)                                   # src j -> dst i
    a = jnp.where(jnp.eye(num_nodes, dtype=bool), 1.0, a)         # self loops
    deg = jnp.sum(a, axis=1)
    d_inv_sqrt = jnp.where(deg > 0, jax.lax.rsqrt(deg), 0.0)
    return d_inv_sqrt[:, None] * a * d_inv_sqrt[None, :]


def gcn_forward(x, a_hat, params, *, training=False):
    """GCN forward: log_softmax(A (relu(A x W1 + b1)) W2 + b2). A_hat prebuilt."""
    del training  # eval-mode dropout is the identity; TODO(synk): train-mode dropout.
    n, f_in = x.shape
    hidden = params["w1"].shape[1]
    num_classes = params["w2"].shape[1]

    np_ = _round_up(n, NODE_TILE)
    f1p = _round_up(f_in, LANE)
    hp = _round_up(hidden, LANE)
    cp = _round_up(num_classes, LANE)

    # Pad to lane-dense shapes; A/X/W in bf16 (f32 accumulation in-kernel).
    a_p = _pad2d(a_hat, np_, np_).astype(jnp.bfloat16)
    x_p = _pad2d(x, np_, f1p).astype(jnp.bfloat16)
    w1_p = _pad2d(params["w1"], f1p, hp).astype(jnp.bfloat16)
    w2_p = _pad2d(params["w2"], hp, cp).astype(jnp.bfloat16)
    b1_p = jnp.pad(params["b1"], (0, hp - hidden)).reshape(1, hp).astype(jnp.float32)
    b2_p = jnp.pad(params["b2"], (0, cp - num_classes)).reshape(1, cp).astype(jnp.float32)

    if np_ <= FUSED_MAX_NODES:
        # A_hat read once; hidden activation never leaves VMEM.
        out_p = _gcn_fused(a_p, x_p, w1_p, b1_p, w2_p, b2_p, num_classes)
    else:
        tm = NODE_TILE
        tk = _pick_tk(np_)
        # Hoisted XW1 (one tiny matmul), then two A-aggregation launches whose
        # HBM traffic is essentially one A_hat pass each.
        xw_p = _matmul_rows(x_p, w1_p, tm=tm)                          # (Np, Hp) bf16
        hw2_p = _gcn_agg_layer1(a_p, xw_p, b1_p, w2_p, tm=tm, tk=tk)   # (Np, Cp) bf16
        out_p = _gcn_agg_layer2(a_p, hw2_p, b2_p, tm=tm, tk=tk,
                                num_classes=num_classes)               # (Np, Cp) f32
    return out_p[:n, :num_classes]


def gcn_reference(x, a_hat, params):
    """Pure-jnp reference (same bf16 quantization of A/X/W as the kernels)."""
    a = a_hat.astype(jnp.bfloat16).astype(jnp.float32)
    xb = x.astype(jnp.bfloat16).astype(jnp.float32)
    w1 = params["w1"].astype(jnp.bfloat16).astype(jnp.float32)
    w2 = params["w2"].astype(jnp.bfloat16).astype(jnp.float32)
    h = jnp.maximum(a @ (xb @ w1) + params["b1"], 0.0)
    logits = a @ (h @ w2) + params["b2"]
    return jax.nn.log_softmax(logits, axis=1)


# ------------------------------- main ---------------------------------------

if __name__ == "__main__":
    # Small synthetic "dataset": N=16 nodes, num_node_features=8,
    # hidden=16 (as in the module), num_classes=4, E=32 edges.
    N, F_IN, HIDDEN, NUM_CLASSES, E = 16, 8, 16, 4, 32

    key = jax.random.PRNGKey(0)
    kx, ke, kw1, kw2, kx2, ke2, kx3, ke3 = jax.random.split(key, 8)

    x = jax.random.normal(kx, (N, F_IN), dtype=jnp.float32)
    edge_index = jax.random.randint(ke, (2, E), 0, N, dtype=jnp.int32)

    params = {
        "w1": jax.random.normal(kw1, (F_IN, HIDDEN), jnp.float32)
              * jnp.sqrt(2.0 / (F_IN + HIDDEN)),
        "b1": jnp.zeros((HIDDEN,), jnp.float32),
        "w2": jax.random.normal(kw2, (HIDDEN, NUM_CLASSES), jnp.float32)
              * jnp.sqrt(2.0 / (HIDDEN + NUM_CLASSES)),
        "b2": jnp.zeros((NUM_CLASSES,), jnp.float32),
    }

    fwd = jax.jit(gcn_forward)

    # --- small graph: fused single-kernel path ---
    a_hat = build_normalized_adjacency(edge_index, N)   # built once, reused
    out = fwd(x, a_hat, params)
    jax.block_until_ready(out)
    ref = gcn_reference(x, a_hat, params)

    assert out.shape == (N, NUM_CLASSES)
    assert jnp.allclose(jnp.sum(jnp.exp(out), axis=1), 1.0, atol=1e-3)
    assert float(jnp.max(jnp.abs(out - ref))) < 5e-2

    # --- medium graph: still the fused path (A_hat read once, no HBM H) ---
    N2, E2 = 512, 4096
    x2 = jax.random.normal(kx2, (N2, F_IN), dtype=jnp.float32)
    edge_index2 = jax.random.randint(ke2, (2, E2), 0, N2, dtype=jnp.int32)
    a_hat2 = build_normalized_adjacency(edge_index2, N2)

    out2 = fwd(x2, a_hat2, params)
    jax.block_until_ready(out2)
    ref2 = gcn_reference(x2, a_hat2, params)

    assert out2.shape == (N2, NUM_CLASSES)
    assert jnp.allclose(jnp.sum(jnp.exp(out2), axis=1), 1.0, atol=1e-3)
    assert float(jnp.max(jnp.abs(out2 - ref2))) < 5e-2

    # --- large graph: exercises the tiled (row, K) aggregation path ---
    N3, E3 = 2560, 20480
    x3 = jax.random.normal(kx3, (N3, F_IN), dtype=jnp.float32)
    edge_index3 = jax.random.randint(ke3, (2, E3), 0, N3, dtype=jnp.int32)
    a_hat3 = build_normalized_adjacency(edge_index3, N3)

    out3 = fwd(x3, a_hat3, params)
    jax.block_until_ready(out3)
    ref3 = gcn_reference(x3, a_hat3, params)

    assert out3.shape == (N3, NUM_CLASSES)
    assert jnp.allclose(jnp.sum(jnp.exp(out3), axis=1), 1.0, atol=1e-3)
    assert float(jnp.max(jnp.abs(out3 - ref3))) < 5e-2

    print("KERNEL_OK")
</pallas_src>

<mosaic_0001>
module attributes {stable_mosaic.version = 11 : i64} {
  func.func @_gcn_fused_kernel(%arg0: i32, %arg1: memref<256x256xbf16, #tpu.memory_space<vmem>>, %arg2: memref<256x128xbf16, #tpu.memory_space<vmem>>, %arg3: memref<128x128xbf16, #tpu.memory_space<vmem>>, %arg4: memref<1x128xf32, #tpu.memory_space<vmem>>, %arg5: memref<128x128xbf16, #tpu.memory_space<vmem>>, %arg6: memref<1x128xf32, #tpu.memory_space<vmem>>, %arg7: memref<256x128xf32, #tpu.memory_space<vmem>>) attributes {dimension_semantics = [#tpu.dimension_semantics<arbitrary>], iteration_bounds = array<i64: 1>, scalar_prefetch = 0 : i64, scratch_operands = 0 : i64, tpu.core_type = #tpu.core_type<tc>, window_params = [{pipeline_mode = #tpu.pipeline_mode<synchronous>, transform_indices = @transform_0, window_bounds = array<i64: 256, 256>}, {pipeline_mode = #tpu.pipeline_mode<synchronous>, transform_indices = @transform_1, window_bounds = array<i64: 256, 128>}, {pipeline_mode = #tpu.pipeline_mode<synchronous>, transform_indices = @transform_2, window_bounds = array<i64: 128, 128>}, {pipeline_mode = #tpu.pipeline_mode<synchronous>, transform_indices = @transform_3, window_bounds = array<i64: 1, 128>}, {pipeline_mode = #tpu.pipeline_mode<synchronous>, transform_indices = @transform_4, window_bounds = array<i64: 128, 128>}, {pipeline_mode = #tpu.pipeline_mode<synchronous>, transform_indices = @transform_5, window_bounds = array<i64: 1, 128>}, {pipeline_mode = #tpu.pipeline_mode<synchronous>, transform_indices = @transform_6, window_bounds = array<i64: 256, 128>}]} {
    %c0 = arith.constant 0 : index
    %c0_0 = arith.constant 0 : index
    %0 = vector.load %arg1[%c0, %c0_0] : memref<256x256xbf16, #tpu.memory_space<vmem>>, vector<256x256xbf16>
    %c0_1 = arith.constant 0 : index
    %c0_2 = arith.constant 0 : index
    %1 = vector.load %arg2[%c0_1, %c0_2] : memref<256x128xbf16, #tpu.memory_space<vmem>>, vector<256x128xbf16>
    %c0_3 = arith.constant 0 : index
    %c0_4 = arith.constant 0 : index
    %2 = vector.load %arg3[%c0_3, %c0_4] : memref<128x128xbf16, #tpu.memory_space<vmem>>, vector<128x128xbf16>
    %cst = arith.constant dense<0.000000e+00> : vector<256x128xf32>
    %3 = tpu.matmul %1, %2, %cst {dimension_numbers = #tpu.dot_dimension_numbers<[1], [0], [0], [1], [0, 0, 1, 1], [], []>} : vector<256x128xbf16>, vector<128x128xbf16>, vector<256x128xf32> -> vector<256x128xf32>
    %4 = arith.truncf %3 : vector<256x128xf32> to vector<256x128xbf16>
    %cst_5 = arith.constant dense<0.000000e+00> : vector<256x128xf32>
    %5 = tpu.matmul %0, %4, %cst_5 {dimension_numbers = #tpu.dot_dimension_numbers<[1], [0], [0], [1], [0, 0, 1, 1], [], []>} : vector<256x256xbf16>, vector<256x128xbf16>, vector<256x128xf32> -> vector<256x128xf32>
    %c0_6 = arith.constant 0 : index
    %c0_7 = arith.constant 0 : index
    %6 = vector.load %arg4[%c0_6, %c0_7] : memref<1x128xf32, #tpu.memory_space<vmem>>, vector<1x128xf32>
    %7 = vector.broadcast %6 : vector<1x128xf32> to vector<256x128xf32>
    %8 = arith.addf %5, %7 : vector<256x128xf32>
    %cst_8 = arith.constant 0.000000e+00 : f32
    %9 = vector.broadcast %cst_8 : f32 to vector<256x128xf32>
    %10 = arith.maximumf %8, %9 : vector<256x128xf32>
    %11 = arith.truncf %10 : vector<256x128xf32> to vector<256x128xbf16>
    %c0_9 = arith.constant 0 : index
    %c0_10 = arith.constant 0 : index
    %12 = vector.load %arg5[%c0_9, %c0_10] : memref<128x128xbf16, #tpu.memory_space<vmem>>, vector<128x128xbf16>
    %cst_11 = arith.constant dense<0.000000e+00> : vector<256x128xf32>
    %13 = tpu.matmul %11, %12, %cst_11 {dimension_numbers = #tpu.dot_dimension_numbers<[1], [0], [0], [1], [0, 0, 1, 1], [], []>} : vector<256x128xbf16>, vector<128x128xbf16>, vector<256x128xf32> -> vector<256x128xf32>
    %14 = arith.truncf %13 : vector<256x128xf32> to vector<256x128xbf16>
    %cst_12 = arith.constant dense<0.000000e+00> : vector<256x128xf32>
    %15 = tpu.matmul %0, %14, %cst_12 {dimension_numbers = #tpu.dot_dimension_numbers<[1], [0], [0], [1], [0, 0, 1, 1], [], []>} : vector<256x256xbf16>, vector<256x128xbf16>, vector<256x128xf32> -> vector<256x128xf32>
    %c0_13 = arith.constant 0 : index
    %c0_14 = arith.constant 0 : index
    %16 = vector.load %arg6[%c0_13, %c0_14] : memref<1x128xf32, #tpu.memory_space<vmem>>, vector<1x128xf32>
    %17 = vector.broadcast %16 : vector<1x128xf32> to vector<256x128xf32>
    %18 = arith.addf %15, %17 : vector<256x128xf32>
    %19 = tpu.iota {dimensions = array<i32: 1>} : vector<256x128xi32>
    %c4_i32 = arith.constant 4 : i32
    %20 = vector.broadcast %c4_i32 : i32 to vector<256x128xi32>
    %21 = arith.cmpi slt, %19, %20 : vector<256x128xi32>
    %cst_15 = arith.constant -1.000000e+30 : f32
    %22 = vector.broadcast %cst_15 : f32 to vector<256x128xf32>
    %23 = arith.select %21, %18, %22 : vector<256x128xi1>, vector<256x128xf32>
    %cst_16 = arith.constant dense<0xFF800000> : vector<256xf32>
    %24 = vector.multi_reduction <maximumf>, %23, %cst_16 [1] : vector<256x128xf32> to vector<256xf32>
    %25 = vector.shape_cast %24 : vector<256xf32> to vector<256x1xf32>
    %26 = vector.broadcast %25 : vector<256x1xf32> to vector<256x128xf32>
    %27 = arith.subf %23, %26 : vector<256x128xf32>
    %28 = math.exp %27 : vector<256x128xf32>
    %cst_17 = arith.constant 0.000000e+00 : f32
    %29 = vector.broadcast %cst_17 : f32 to vector<256x128xf32>
    %30 = arith.select %21, %28, %29 : vector<256x128xi1>, vector<256x128xf32>
    %cst_18 = arith.constant dense<0.000000e+00> : vector<256xf32>
    %31 = vector.multi_reduction <add>, %30, %cst_18 [1] : vector<256x128xf32> to vector<256xf32>
    %32 = vector.shape_cast %31 : vector<256xf32> to vector<256x1xf32>
    %33 = math.log %32 : vector<256x1xf32>
    %34 = vector.broadcast %25 : vector<256x1xf32> to vector<256x128xf32>
    %35 = arith.subf %23, %34 : vector<256x128xf32>
    %36 = vector.broadcast %33 : vector<256x1xf32> to vector<256x128xf32>
    %37 = arith.subf %35, %36 : vector<256x128xf32>
    %c0_19 = arith.constant 0 : index
    %c0_20 = arith.constant 0 : index
    %38 = vector.load %arg7[%c0_19, %c0_20] : memref<256x128xf32, #tpu.memory_space<vmem>>, vector<256x128xf32>
    tpu.vector_store %arg7[%c0_19, %c0_20], %37 {strides = array<i32>} : memref<256x128xf32, #tpu.memory_space<vmem>>, vector<256x128xf32>,
    return
  }
  func.func @transform_0(%arg0: i32) -> (i32, i32) {
    %c0_i32 = arith.constant 0 : i32
    %c0_i32_0 = arith.constant 0 : i32
    %c0_i32_1 = arith.constant 0 : i32
    return %c0_i32, %c0_i32_0 : i32, i32
  }
  func.func @transform_1(%arg0: i32) -> (i32, i32) {
    %c0_i32 = arith.constant 0 : i32
    %c0_i32_0 = arith.constant 0 : i32
    %c0_i32_1 = arith.constant 0 : i32
    return %c0_i32, %c0_i32_0 : i32, i32
  }
  func.func @transform_2(%arg0: i32) -> (i32, i32) {
    %c0_i32 = arith.constant 0 : i32
    %c0_i32_0 = arith.constant 0 : i32
    %c0_i32_1 = arith.constant 0 : i32
    return %c0_i32, %c0_i32_0 : i32, i32
  }
  func.func @transform_3(%arg0: i32) -> (i32, i32) {
    %c0_i32 = arith.constant 0 : i32
    %c0_i32_0 = arith.constant 0 : i32
    %c0_i32_1 = arith.constant 0 : i32
    return %c0_i32, %c0_i32_0 : i32, i32
  }
  func.func @transform_4(%arg0: i32) -> (i32, i32) {
    %c0_i32 = arith.constant 0 : i32
    %c0_i32_0 = arith.constant 0 : i32
    %c0_i32_1 = arith.constant 0 : i32
    return %c0_i32, %c0_i32_0 : i32, i32
  }
  func.func @transform_5(%arg0: i32) -> (i32, i32) {
    %c0_i32 = arith.constant 0 : i32
    %c0_i32_0 = arith.constant 0 : i32
    %c0_i32_1 = arith.constant 0 : i32
    return %c0_i32, %c0_i32_0 : i32, i32
  }
  func.func @transform_6(%arg0: i32) -> (i32, i32) {
    %c0_i32 = arith.constant 0 : i32
    %c0_i32_0 = arith.constant 0 : i32
    %c0_i32_1 = arith.constant 0 : i32
    return %c0_i32, %c0_i32_0 : i32, i32
  }
}

</mosaic_0001>

<bundles_post_ra>
// kernel: gcn_forward.1
= control target key start
LH: loop header
LB: loop body
LE: loop exit
PB: predicated region body
PF: predicated region fallthrough
CT: control target
= control target key end

     0   :  { %s3187_s2 = inlined_call_operand.vmem [shape: bf16[128,128], index: 2, kind: input, shape index: {}]   ;;  %s3188_s1 = inlined_call_operand.vmem [shape: bf16[256,128], index: 1, kind: input, shape index: {}]   ;;  %s3189_s0 = inlined_call_operand.vmem [shape: bf16[256,256], index: 0, kind: input, shape index: {}]   ;;  %s3190_s4 = inlined_call_operand.vmem [shape: bf16[128,128], index: 4, kind: input, shape index: {}]   ;;  %s3191_s3 = inlined_call_operand.vmem [shape: f32[1,128], index: 3, kind: input, shape index: {}]   ;;  %s3192_s5 = inlined_call_operand.vmem [shape: f32[1,128], index: 5, kind: input, shape index: {}]   ;;  %s3193_s6 = inlined_call_operand.vmem [shape: f32[256,128], index: 6, kind: output, shape index: {}]  }
   0x1   :  { %v2067_v0 = vld [vmem:[%s3187_s2] sm:$0xff]   ;;  %v2068_v1 = vld [vmem:[%s3187_s2 + $0x8] sm:$0xff]   ;;  %v2069_v2 = vld [vmem:[%s3187_s2 + $0x10] sm:$0xff]  }
   0x2   :  { %1971 = vmatprep.subr.bf16.mxu1 %v2067_v0  ;;  %v2070_v3 = vld [vmem:[%s3187_s2 + $0x18] sm:$0xff]   ;;  %v2075_v4 = vld [vmem:[%s3188_s1] sm:$0xff]   ;;  %v2072_v6 = vld [vmem:[%s3187_s2 + $0x28] sm:$0xff]  }
   0x3   :  { %1972 = vmatpush3.bf16.msra.mxu1 %v2067_v0  ;;  %1987 = vmatprep.mubr.bf16.mxu1 %v2075_v4  ;;  %v2071_v5 = vld [vmem:[%s3187_s2 + $0x20] sm:$0xff]   ;;  %v2073_v7 = vld [vmem:[%s3187_s2 + $0x30] sm:$0xff]   ;;  %v2074_v8 = vld [vmem:[%s3187_s2 + $0x38] sm:$0xff]  }
   0x4   :  { %1973 = vmatprep.subr.bf16.mxu1 %v2068_v1  ;;  %v2076_v9 = vld [vmem:[%s3188_s1 + $0x8] sm:$0xff]   ;;  %v2077_v10 = vld [vmem:[%s3188_s1 + $0x10] sm:$0xff]   ;;  %v2078_v11 = vld [vmem:[%s3188_s1 + $0x18] sm:$0xff]  }
   0x5   :  { %v2079_v12 = vld [vmem:[%s3188_s1 + $0x20] sm:$0xff]   ;;  %v2080_v13 = vld [vmem:[%s3188_s1 + $0x28] sm:$0xff]   ;;  %v2081_v14 = vld [vmem:[%s3188_s1 + $0x30] sm:$0xff]  }
   0x6   :  { %v2082_v15 = vld [vmem:[%s3188_s1 + $0x38] sm:$0xff]   ;;  %v2083_v16 = vld [vmem:[%s3188_s1 + $0x40] sm:$0xff]   ;;  %v2084_v17 = vld [vmem:[%s3188_s1 + $0x48] sm:$0xff]  }
   0x7   :  { %1974 = vmatpush3.bf16.msra.mxu1 %v2068_v1  ;;  %v2085_v18 = vld [vmem:[%s3188_s1 + $0x50] sm:$0xff]   ;;  %v2086_v19 = vld [vmem:[%s3188_s1 + $0x58] sm:$0xff]   ;;  %v2087_v20 = vld [vmem:[%s3188_s1 + $0x60] sm:$0xff]  }
   0x8   :  { %1975 = vmatprep.subr.bf16.mxu1 %v2069_v2  ;;  %v2088_v21 = vld [vmem:[%s3188_s1 + $0x68] sm:$0xff]   ;;  %v2089_v22 = vld [vmem:[%s3188_s1 + $0x70] sm:$0xff]   ;;  %v2090_v23 = vld [vmem:[%s3188_s1 + $0x78] sm:$0xff]  }
   0x9   :  { %v2385_v24 = vld [vmem:[%s3189_s0 + $0x4] ss:$8 sps:$4 sm:$0xff]  }
   0xb   :  { %1976 = vmatpush3.bf16.msra.mxu1 %v2069_v2 }
   0xc   :  { %1977 = vmatprep.subr.bf16.mxu1 %v2070_v3 }
   0xf   :  { %1978 = vmatpush3.bf16.msra.mxu1 %v2070_v3 }
  0x10   :  { %1979 = vmatprep.subr.bf16.mxu1 %v2071_v5 }
  0x13   :  { %1980 = vmatpush3.bf16.msra.mxu1 %v2071_v5 }
  0x14   :  { %1981 = vmatprep.subr.bf16.mxu1 %v2072_v6 }
  0x17   :  { %1982 = vmatpush3.bf16.msra.mxu1 %v2072_v6 }
  0x18   :  { %1983 = vmatprep.subr.bf16.mxu1 %v2073_v7 }
  0x1b   :  { %1984 = vmatpush3.bf16.msra.mxu1 %v2073_v7 }
  0x1c   :  { %1985 = vmatprep.subr.bf16.mxu1 %v2074_v8 }
  0x1f   :  { %1986 = vmatpush3.bf16.msra.mxu1 %v2074_v8 }
  0x22   :  { %1988 = vmatmul.mubr.bf16.vlgmr.msra.gmra.mrb[0].mxu1 %v2076_v9  ;;  %v2139_v9 = vld [vmem:[%s3190_s4] sm:$0xff]  }
  0x23   :  { %1991 = vmatprep.mubr.bf16.mxu1 %v2077_v10  ;;  %v2394_v10 = vld [vmem:[%s3189_s0] ss:$8 sps:$4 sm:$0xff]   ;;  %2019 = vmatprep.subr.bf16.mxu0 %v2139_v9 }
  0x24   :  { %2020 = vmatpush3.bf16.msra.mxu0 %v2139_v9 }
  0x2a   :  { %1992 = vmatmul.mubr.bf16.gmra.mrb[4].mxu1 %v2078_v11  ;;  %v2140_v11 = vld [vmem:[%s3190_s4 + $0x8] sm:$0xff]  }
  0x2b   :  { %1995 = vmatprep.mubr.bf16.mxu1 %v2079_v12  ;;  %v2402_v12 = vld [vmem:[%s3189_s0 + $0x14] ss:$8 sps:$4 sm:$0xff]   ;;  %2021 = vmatprep.subr.bf16.mxu0 %v2140_v11 }
  0x2c   :  { %2022 = vmatpush3.bf16.msra.mxu0 %v2140_v11 }
  0x32   :  { %1996 = vmatmul.mubr.bf16.gmra.mrb[8].mxu1 %v2080_v13  ;;  %v2141_v13 = vld [vmem:[%s3190_s4 + $0x10] sm:$0xff]  }
  0x33   :  { %1999 = vmatprep.mubr.bf16.mxu1 %v2081_v14  ;;  %2023 = vmatprep.subr.bf16.mxu0 %v2141_v13  ;;  %v2142_v14 = vld [vmem:[%s3190_s4 + $0x18] sm:$0xff]  }
  0x34   :  { %2024 = vmatpush3.bf16.msra.mxu0 %v2141_v13 }
  0x35   :  { %2025 = vmatprep.subr.bf16.mxu0 %v2142_v14 }
  0x38   :  { %2026 = vmatpush3.bf16.msra.mxu0 %v2142_v14 }
  0x3a   :  { %2000 = vmatmul.mubr.bf16.gmra.mrb[12].mxu1 %v2082_v15  ;;  %v2415_v15 = vld [vmem:[%s3189_s0 + $0x10] ss:$8 sps:$4 sm:$0xff]  }
  0x3b   :  { %2003 = vmatprep.mubr.bf16.mxu1 %v2083_v16  ;;  %v2420_v16 = vld [vmem:[%s3189_s0 + $0x24] ss:$8 sps:$4 sm:$0xff]  }
  0x42   :  { %2004 = vmatmul.mubr.bf16.gmra.mrb[16].mxu1 %v2084_v17  ;;  %v2427_v17 = vld [vmem:[%s3189_s0 + $0x20] ss:$8 sps:$4 sm:$0xff]  }
  0x43   :  { %2007 = vmatprep.mubr.bf16.mxu1 %v2085_v18  ;;  %v2432_v18 = vld [vmem:[%s3189_s0 + $0x34] ss:$8 sps:$4 sm:$0xff]  }
  0x4a   :  { %2008 = vmatmul.mubr.bf16.gmra.mrb[20].mxu1 %v2086_v19  ;;  %v2439_v19 = vld [vmem:[%s3189_s0 + $0x30] ss:$8 sps:$4 sm:$0xff]  }
  0x4b   :  { %2011 = vmatprep.mubr.bf16.mxu1 %v2087_v20  ;;  %v2444_v20 = vld [vmem:[%s3189_s0 + $0x44] ss:$8 sps:$4 sm:$0xff]  }
  0x52   :  { %2012 = vmatmul.mubr.bf16.gmra.mrb[24].mxu1 %v2088_v21  ;;  %v2451_v21 = vld [vmem:[%s3189_s0 + $0x40] ss:$8 sps:$4 sm:$0xff]  }
  0x53   :  { %2015 = vmatprep.mubr.bf16.mxu1 %v2089_v22  ;;  %v2456_v22 = vld [vmem:[%s3189_s0 + $0x54] ss:$8 sps:$4 sm:$0xff]  }
  0x5a   :  { %2016 = vmatmul.mubr.bf16.gmra.mrb[28].mxu1 %v2090_v23  ;;  %v2463_v23 = vld [vmem:[%s3189_s0 + $0x50] ss:$8 sps:$4 sm:$0xff]  }
  0x5b   :  { %624 = vmatprep.mubr.bf16.mxu1 %v2385_v24 }
  0xf5   :  { %v1989_v25 = vpop.f32.mrb[0].mxu1 }
  0xf6   :  { %v282_v26 = vpop.f32.mrb[1].mxu1 }
  0xf7   :  { %v1990_v27 = vpop.f32.mrb[2].mxu1 }
  0xf8   :  { %v410_v28 = vpack.c.bf16 %v1990_v27, %v1989_v25  ;;  %v285_v29 = vpop.f32.mrb[3].mxu1  ;;  %v2468_v25 = vld [vmem:[%s3189_s0 + $0x64] ss:$8 sps:$4 sm:$0xff]   ;;  %v2480_v27 = vld [vmem:[%s3189_s0 + $0x74] ss:$8 sps:$4 sm:$0xff]  }
  0xf9   :  { %v409_v30 = vpack.c.bf16 %v285_v29, %v282_v26  ;;  %v2475_v26 = vld [vmem:[%s3189_s0 + $0x60] ss:$8 sps:$4 sm:$0xff]   ;;  %v2492_v29 = vld [vmem:[%s3189_s0 + $0x84] ss:$8 sps:$4 sm:$0xff]  }
  0xfd   :  { %v1993_v31 = vpop.f32.mrb[4].mxu1 }
  0xfe   :  { %v298_v32 = vpop.f32.mrb[5].mxu1 }
  0xff   :  { %v1994_v33 = vpop.f32.mrb[6].mxu1 }
 0x100   :  { %v412_v34 = vpack.c.bf16 %v1994_v33, %v1993_v31  ;;  %v301_v35 = vpop.f32.mrb[7].mxu1  ;;  %v2504_v31 = vld [vmem:[%s3189_s0 + $0x94] ss:$8 sps:$4 sm:$0xff]   ;;  %v2516_v33 = vld [vmem:[%s3189_s0 + $0xa4] ss:$8 sps:$4 sm:$0xff]  }
 0x101   :  { %v411_v36 = vpack.c.bf16 %v301_v35, %v298_v32  ;;  %v2511_v32 = vld [vmem:[%s3189_s0 + $0x90] ss:$8 sps:$4 sm:$0xff]   ;;  %v2528_v35 = vld [vmem:[%s3189_s0 + $0xb4] ss:$8 sps:$4 sm:$0xff]  }
 0x105   :  { %v1997_v37 = vpop.f32.mrb[8].mxu1 }
 0x106   :  { %v314_v38 = vpop.f32.mrb[9].mxu1 }
 0x107   :  { %v1998_v39 = vpop.f32.mrb[10].mxu1 }
 0x108   :  { %v414_v40 = vpack.c.bf16 %v1998_v39, %v1997_v37  ;;  %v317_v41 = vpop.f32.mrb[11].mxu1  ;;  %v2540_v37 = vld [vmem:[%s3189_s0 + $0xc4] ss:$8 sps:$4 sm:$0xff]  }
 0x109   :  { %v413_v42 = vpack.c.bf16 %v317_v41, %v314_v38  ;;  %v2143_v38 = vld [vmem:[%s3190_s4 + $0x20] sm:$0xff]   ;;  %v2144_v39 = vld [vmem:[%s3190_s4 + $0x28] sm:$0xff]   ;;  %v2558_v41 = vld [vmem:[%s3189_s0 + $0xd4] ss:$8 sps:$4 sm:$0xff]  }
 0x10a   :  { %2027 = vmatprep.subr.bf16.mxu0 %v2143_v38 }
 0x10b   :  { %2028 = vmatpush3.bf16.msra.mxu0 %v2143_v38 }
 0x10c   :  { %2029 = vmatprep.subr.bf16.mxu0 %v2144_v39 }
 0x10d   :  { %v2001_v43 = vpop.f32.mrb[12].mxu1 }
 0x10e   :  { %v330_v44 = vpop.f32.mrb[13].mxu1 }
 0x10f   :  { %v2002_v45 = vpop.f32.mrb[14].mxu1  ;;  %2030 = vmatpush3.bf16.msra.mxu0 %v2144_v39 }
 0x110   :  { %v416_v46 = vpack.c.bf16 %v2002_v45, %v2001_v43  ;;  %v333_v47 = vpop.f32.mrb[15].mxu1  ;;  %v2146_v43 = vld [vmem:[%s3190_s4 + $0x38] sm:$0xff]   ;;  %v2576_v45 = vld [vmem:[%s3189_s0 + $0xe4] ss:$8 sps:$4 sm:$0xff]  }
 0x111   :  { %v415_v48 = vpack.c.bf16 %v333_v47, %v330_v44  ;;  %v2571_v44 = vld [vmem:[%s3189_s0 + $0xd0] ss:$8 sps:$4 sm:$0xff]   ;;  %v2588_v47 = vld [vmem:[%s3189_s0 + $0xf4] ss:$8 sps:$4 sm:$0xff]  }
 0x115   :  { %v2005_v49 = vpop.f32.mrb[16].mxu1 }
 0x116   :  { %v346_v50 = vpop.f32.mrb[17].mxu1 }
 0x117   :  { %v2006_v51 = vpop.f32.mrb[18].mxu1 }
 0x118   :  { %v418_v52 = vpack.c.bf16 %v2006_v51, %v2005_v49  ;;  %v349_v53 = vpop.f32.mrb[19].mxu1  ;;  %v2601_v51 = vld [vmem:[%s3191_s3] ss:$0 sm:$0xff] }
 0x119   :  { %v417_v54 = vpack.c.bf16 %v349_v53, %v346_v50 }
 0x11b   :  { %1723 = vmatprep.subr.bf16.mxu1 %v417_v54 }
 0x11c   :  { %1724 = vmatpush3.bf16.msra.mxu1 %v409_v30  ;;  %v2499_v30 = vld [vmem:[%s3189_s0 + $0x80] ss:$8 sps:$4 sm:$0xff]  }
 0x11d   :  { %v2009_v55 = vpop.f32.mrb[20].mxu1  ;;  %1725 = vmatprep.subr.bf16.mxu1 %v418_v52 }
 0x11e   :  { %v362_v56 = vpop.f32.mrb[21].mxu1 }
 0x11f   :  { %v2010_v57 = vpop.f32.mrb[22].mxu1 }
 0x120   :  { %v420_v58 = vpack.c.bf16 %v2010_v57, %v2009_v55  ;;  %v365_v59 = vpop.f32.mrb[23].mxu1  ;;  %1726 = vmatpush3.bf16.msra.mxu1 %v410_v28  ;;  %v2487_v28 = vld [vmem:[%s3189_s0 + $0x70] ss:$8 sps:$4 sm:$0xff]  }
 0x121   :  { %v419_v60 = vpack.c.bf16 %v365_v59, %v362_v56 }
 0x123   :  { %1727 = vmatprep.subr.bf16.mxu1 %v419_v60 }
 0x124   :  { %1728 = vmatpush3.bf16.msra.mxu1 %v411_v36  ;;  %v2535_v36 = vld [vmem:[%s3189_s0 + $0xb0] ss:$8 sps:$4 sm:$0xff]  }
 0x125   :  { %v2013_v61 = vpop.f32.mrb[24].mxu1  ;;  %1729 = vmatprep.subr.bf16.mxu1 %v420_v58 }
 0x126   :  { %v378_v62 = vpop.f32.mrb[25].mxu1 }
 0x127   :  { %v2014_v63 = vpop.f32.mrb[26].mxu1 }
 0x128   :  { %v422_v0 = vpack.c.bf16 %v2014_v63, %v2013_v61  ;;  %v381_v1 = vpop.f32.mrb[27].mxu1  ;;  %1730 = vmatpush3.bf16.msra.mxu1 %v412_v34  ;;  %v2523_v34 = vld [vmem:[%s3189_s0 + $0xa0] ss:$8 sps:$4 sm:$0xff]  }
 0x129   :  { %v421_v2 = vpack.c.bf16 %v381_v1, %v378_v62 }
 0x12b   :  { %1731 = vmatprep.subr.bf16.mxu1 %v421_v2 }
 0x12c   :  { %1732 = vmatpush3.bf16.msra.mxu1 %v413_v42  ;;  %v2145_v42 = vld [vmem:[%s3190_s4 + $0x30] sm:$0xff]  }
 0x12d   :  { %v2017_v3 = vpop.f32.mrb[28].mxu1  ;;  %1733 = vmatprep.subr.bf16.mxu1 %v422_v0  ;;  %2031 = vmatprep.subr.bf16.mxu0 %v2145_v42 }
 0x12e   :  { %v394_v4 = vpop.f32.mrb[29].mxu1  ;;  %2032 = vmatpush3.bf16.msra.mxu0 %v2145_v42 }
 0x12f   :  { %v2018_v5 = vpop.f32.mrb[30].mxu1  ;;  %2033 = vmatprep.subr.bf16.mxu0 %v2146_v43 }
 0x130   :  { %v424_v6 = vpack.c.bf16 %v2018_v5, %v2017_v3  ;;  %v397_v7 = vpop.f32.mrb[31].mxu1  ;;  %1734 = vmatpush3.bf16.msra.mxu1 %v414_v40  ;;  %v2553_v40 = vld [vmem:[%s3189_s0 + $0xc0] ss:$8 sps:$4 sm:$0xff]  }
 0x131   :  { %v423_v8 = vpack.c.bf16 %v397_v7, %v394_v4 }
 0x132   :  { %2034 = vmatpush3.bf16.msra.mxu0 %v2146_v43 }
 0x133   :  { %1735 = vmatprep.subr.bf16.mxu1 %v423_v8 }
 0x134   :  { %1736 = vmatpush3.bf16.msra.mxu1 %v415_v48  ;;  %v2595_v48 = vld [vmem:[%s3189_s0 + $0xf0] ss:$8 sps:$4 sm:$0xff]  }
 0x135   :  { %1737 = vmatprep.subr.bf16.mxu1 %v424_v6 }
 0x138   :  { %1738 = vmatpush3.bf16.msra.mxu1 %v416_v46  ;;  %v2583_v46 = vld [vmem:[%s3189_s0 + $0xe0] ss:$8 sps:$4 sm:$0xff]  }
 0x13b   :  { %625 = vmatmul.mubr.bf16.vlgmr.msra.gmra.mrb[32].mxu1 %v2394_v10 }
 0x13c   :  { %632 = vmatprep.mubr.bf16.mxu1 %v2402_v12 }
 0x143   :  { %633 = vmatmul.mubr.bf16.gmra.mrb[36].mxu1 %v2415_v15 }
 0x144   :  { %640 = vmatprep.mubr.bf16.mxu1 %v2420_v16 }
 0x14b   :  { %641 = vmatmul.mubr.bf16.gmra.mrb[40].mxu1 %v2427_v17 }
 0x14c   :  { %648 = vmatprep.mubr.bf16.mxu1 %v2432_v18 }
 0x153   :  { %649 = vmatmul.mubr.bf16.gmra.mrb[44].mxu1 %v2439_v19 }
 0x154   :  { %656 = vmatprep.mubr.bf16.mxu1 %v2444_v20 }
 0x15b   :  { %657 = vmatmul.mubr.bf16.gmra.mrb[48].mxu1 %v2451_v21 }
 0x15c   :  { %664 = vmatprep.mubr.bf16.mxu1 %v2456_v22 }
 0x163   :  { %665 = vmatmul.mubr.bf16.gmra.mrb[52].mxu1 %v2463_v23 }
 0x164   :  { %672 = vmatprep.mubr.bf16.mxu1 %v2468_v25 }
 0x16b   :  { %673 = vmatmul.mubr.bf16.gmra.mrb[56].mxu1 %v2475_v26 }
 0x16c   :  { %680 = vmatprep.mubr.bf16.mxu1 %v2480_v27 }
 0x173   :  { %681 = vmatmul.mubr.bf16.gmra.mrb[60].mxu1 %v2487_v28 }
 0x174   :  { %688 = vmatprep.mubr.bf16.mxu1 %v2492_v29 }
 0x17b   :  { %689 = vmatmul.mubr.bf16.gmra.mrb[64].mxu1 %v2499_v30 }
 0x17c   :  { %696 = vmatprep.mubr.bf16.mxu1 %v2504_v31 }
 0x183   :  { %697 = vmatmul.mubr.bf16.gmra.mrb[68].mxu1 %v2511_v32 }
 0x184   :  { %704 = vmatprep.mubr.bf16.mxu1 %v2516_v33 }
 0x18b   :  { %705 = vmatmul.mubr.bf16.gmra.mrb[72].mxu1 %v2523_v34 }
 0x18c   :  { %712 = vmatprep.mubr.bf16.mxu1 %v2528_v35 }
 0x193   :  { %713 = vmatmul.mubr.bf16.gmra.mrb[76].mxu1 %v2535_v36 }
 0x194   :  { %720 = vmatprep.mubr.bf16.mxu1 %v2540_v37 }
 0x19b   :  { %721 = vmatmul.mubr.bf16.gmra.mrb[80].mxu1 %v2553_v40 }
 0x19c   :  { %728 = vmatprep.mubr.bf16.mxu1 %v2558_v41 }
 0x1a3   :  { %729 = vmatmul.mubr.bf16.gmra.mrb[84].mxu1 %v2571_v44 }
 0x1a4   :  { %736 = vmatprep.mubr.bf16.mxu1 %v2576_v45 }
 0x1ab   :  { %737 = vmatmul.mubr.bf16.gmra.mrb[88].mxu1 %v2583_v46 }
 0x1ac   :  { %744 = vmatprep.mubr.bf16.mxu1 %v2588_v47 }
 0x1b3   :  { %745 = vmatmul.mubr.bf16.gmra.mrb[92].mxu1 %v2595_v48 }
 0x20e   :  { %v1739_v49 = vpop.f32.mrb[32].mxu1 }
 0x20f   :  { %v1740_v50 = vpop.f32.mrb[33].mxu1 }
 0x210   :  { %v1741_v52 = vadd.f32 %v1740_v50, %v1739_v49  ;;  %v1742_v53 = vpop.f32.mrb[34].mxu1 }
 0x211   :  { %v1743_v54 = vpop.f32.mrb[35].mxu1 }
 0x212   :  { %v1744_v55 = vadd.f32 %v1743_v54, %v1742_v53  ;;  %v627_v56 = vadd.f32 %v1741_v52, %v2601_v51 }
 0x214   :  { %v630_v57 = vadd.f32 %v1744_v55, %v2601_v51  ;;  %v753_v59 = vmax.f32 %v627_v56, 0.0 }
 0x216   :  { %v1745_v58 = vpop.f32.mrb[36].mxu1  ;;  %v754_v60 = vmax.f32 %v630_v57, 0.0 }
 0x217   :  { %v1746_v61 = vpop.f32.mrb[37].mxu1 }
 0x218   :  { %v1747_v62 = vadd.f32 %v1746_v61, %v1745_v58  ;;  %v1748_v63 = vpop.f32.mrb[38].mxu1  ;;  %v785_v0 = vpack.c.bf16 %v754_v60, %v753_v59 }
 0x219   :  { %v1749_v1 = vpop.f32.mrb[39].mxu1 }
 0x21a   :  { %v635_v2 = vadd.f32 %v1747_v62, %v2601_v51  ;;  %v1750_v3 = vadd.f32 %v1749_v1, %v1748_v63  ;;  %2035 = vmatprep.mubr.bf16.mxu0 %v785_v0 }
 0x21c   :  { %v638_v4 = vadd.f32 %v1750_v3, %v2601_v51  ;;  %v755_v5 = vmax.f32 %v635_v2, 0.0 }
 0x21e   :  { %v756_v6 = vmax.f32 %v638_v4, 0.0  ;;  %v1751_v7 = vpop.f32.mrb[40].mxu1 }
 0x21f   :  { %v1752_v8 = vpop.f32.mrb[41].mxu1 }
 0x220   :  { %v1753_v9 = vadd.f32 %v1752_v8, %v1751_v7  ;;  %v786_v11 = vpack.c.bf16 %v756_v6, %v755_v5  ;;  %v1754_v13 = vpop.f32.mrb[42].mxu1 }
 0x221   :  { %v1755_v14 = vpop.f32.mrb[43].mxu1 }
 0x222   :  { %v643_v38 = vadd.f32 %v1753_v9, %v2601_v51  ;;  %2036 = vmatmul.mubr.bf16.vlgmr.msra.gmra.mrb[0].mxu0 %v786_v11  ;;  %v1756_v39 = vadd.f32 %v1755_v14, %v1754_v13 }
 0x224   :  { %v646_v42 = vadd.f32 %v1756_v39, %v2601_v51  ;;  %v757_v43 = vmax.f32 %v643_v38, 0.0 }
 0x226   :  { %v758_v49 = vmax.f32 %v646_v42, 0.0  ;;  %v1757_v50 = vpop.f32.mrb[44].mxu1 }
 0x227   :  { %v1758_v52 = vpop.f32.mrb[45].mxu1 }
 0x228   :  { %v1759_v53 = vadd.f32 %v1758_v52, %v1757_v50  ;;  %v1760_v54 = vpop.f32.mrb[46].mxu1  ;;  %v787_v55 = vpack.c.bf16 %v758_v49, %v757_v43 }
 0x229   :  { %v1761_v56 = vpop.f32.mrb[47].mxu1 }
 0x22a   :  { %v651_v57 = vadd.f32 %v1759_v53, %v2601_v51  ;;  %v1762_v58 = vadd.f32 %v1761_v56, %v1760_v54  ;;  %2039 = vmatprep.mubr.bf16.mxu0 %v787_v55 }
 0x22c   :  { %v654_v59 = vadd.f32 %v1762_v58, %v2601_v51  ;;  %v759_v60 = vmax.f32 %v651_v57, 0.0 }
 0x22e   :  { %v760_v61 = vmax.f32 %v654_v59, 0.0  ;;  %v1763_v62 = vpop.f32.mrb[48].mxu1 }
 0x22f   :  { %v1764_v63 = vpop.f32.mrb[49].mxu1 }
 0x230   :  { %v1765_v0 = vadd.f32 %v1764_v63, %v1763_v62  ;;  %v1766_v1 = vpop.f32.mrb[50].mxu1  ;;  %v788_v2 = vpack.c.bf16 %v760_v61, %v759_v60 }
 0x231   :  { %v1767_v3 = vpop.f32.mrb[51].mxu1 }
 0x232   :  { %v659_v4 = vadd.f32 %v1765_v0, %v2601_v51  ;;  %2040 = vmatmul.mubr.bf16.gmra.mrb[4].mxu0 %v788_v2  ;;  %v1768_v5 = vadd.f32 %v1767_v3, %v1766_v1 }
 0x234   :  { %v662_v6 = vadd.f32 %v1768_v5, %v2601_v51  ;;  %v761_v7 = vmax.f32 %v659_v4, 0.0 }
 0x236   :  { %v762_v8 = vmax.f32 %v662_v6, 0.0  ;;  %v1769_v9 = vpop.f32.mrb[52].mxu1 }
 0x237   :  { %v1770_v11 = vpop.f32.mrb[53].mxu1 }
 0x238   :  { %v1771_v13 = vadd.f32 %v1770_v11, %v1769_v9  ;;  %v1772_v14 = vpop.f32.mrb[54].mxu1  ;;  %v789_v38 = vpack.c.bf16 %v762_v8, %v761_v7 }
 0x239   :  { %v1773_v39 = vpop.f32.mrb[55].mxu1 }
 0x23a   :  { %v667_v42 = vadd.f32 %v1771_v13, %v2601_v51  ;;  %v1774_v43 = vadd.f32 %v1773_v39, %v1772_v14  ;;  %2043 = vmatprep.mubr.bf16.mxu0 %v789_v38 }
 0x23c   :  { %v670_v49 = vadd.f32 %v1774_v43, %v2601_v51  ;;  %v763_v50 = vmax.f32 %v667_v42, 0.0 }
 0x23e   :  { %v764_v52 = vmax.f32 %v670_v49, 0.0  ;;  %v1775_v53 = vpop.f32.mrb[56].mxu1 }
 0x23f   :  { %v1776_v54 = vpop.f32.mrb[57].mxu1 }
 0x240   :  { %v1777_v55 = vadd.f32 %v1776_v54, %v1775_v53  ;;  %v1778_v56 = vpop.f32.mrb[58].mxu1  ;;  %v790_v57 = vpack.c.bf16 %v764_v52, %v763_v50 }
 0x241   :  { %v1779_v58 = vpop.f32.mrb[59].mxu1 }
 0x242   :  { %v675_v59 = vadd.f32 %v1777_v55, %v2601_v51  ;;  %v1780_v60 = vadd.f32 %v1779_v58, %v1778_v56  ;;  %2044 = vmatmul.mubr.bf16.gmra.mrb[8].mxu0 %v790_v57 }
 0x244   :  { %v678_v61 = vadd.f32 %v1780_v60, %v2601_v51  ;;  %v765_v62 = vmax.f32 %v675_v59, 0.0 }
 0x246   :  { %v766_v63 = vmax.f32 %v678_v61, 0.0  ;;  %v1781_v0 = vpop.f32.mrb[60].mxu1 }
 0x247   :  { %v1782_v1 = vpop.f32.mrb[61].mxu1 }
 0x248   :  { %v1783_v2 = vadd.f32 %v1782_v1, %v1781_v0  ;;  %v1784_v3 = vpop.f32.mrb[62].mxu1  ;;  %v791_v4 = vpack.c.bf16 %v766_v63, %v765_v62 }
 0x249   :  { %v1785_v5 = vpop.f32.mrb[63].mxu1 }
 0x24a   :  { %v683_v6 = vadd.f32 %v1783_v2, %v2601_v51  ;;  %v1786_v7 = vadd.f32 %v1785_v5, %v1784_v3  ;;  %2047 = vmatprep.mubr.bf16.mxu0 %v791_v4 }
 0x24c   :  { %v686_v8 = vadd.f32 %v1786_v7, %v2601_v51  ;;  %v767_v9 = vmax.f32 %v683_v6, 0.0 }
 0x24e   :  { %v768_v11 = vmax.f32 %v686_v8, 0.0  ;;  %v1787_v13 = vpop.f32.mrb[64].mxu1 }
 0x24f   :  { %v1788_v14 = vpop.f32.mrb[65].mxu1 }
 0x250   :  { %v1789_v38 = vadd.f32 %v1788_v14, %v1787_v13  ;;  %v1790_v39 = vpop.f32.mrb[66].mxu1  ;;  %v792_v42 = vpack.c.bf16 %v768_v11, %v767_v9 }
 0x251   :  { %v1791_v43 = vpop.f32.mrb[67].mxu1 }
 0x252   :  { %v691_v49 = vadd.f32 %v1789_v38, %v2601_v51  ;;  %v1792_v50 = vadd.f32 %v1791_v43, %v1790_v39  ;;  %2048 = vmatmul.mubr.bf16.gmra.mrb[12].mxu0 %v792_v42 }
 0x254   :  { %v694_v52 = vadd.f32 %v1792_v50, %v2601_v51  ;;  %v769_v53 = vmax.f32 %v691_v49, 0.0 }
 0x256   :  { %v770_v54 = vmax.f32 %v694_v52, 0.0  ;;  %v1793_v55 = vpop.f32.mrb[68].mxu1 }
 0x257   :  { %v1794_v56 = vpop.f32.mrb[69].mxu1 }
 0x258   :  { %v1795_v57 = vadd.f32 %v1794_v56, %v1793_v55  ;;  %v1796_v58 = vpop.f32.mrb[70].mxu1  ;;  %v793_v59 = vpack.c.bf16 %v770_v54, %v769_v53 }
 0x259   :  { %v1797_v60 = vpop.f32.mrb[71].mxu1 }
 0x25a   :  { %v699_v61 = vadd.f32 %v1795_v57, %v2601_v51  ;;  %v1798_v62 = vadd.f32 %v1797_v60, %v1796_v58  ;;  %2051 = vmatprep.mubr.bf16.mxu0 %v793_v59 }
 0x25c   :  { %v702_v63 = vadd.f32 %v1798_v62, %v2601_v51  ;;  %v771_v0 = vmax.f32 %v699_v61, 0.0 }
 0x25e   :  { %v772_v1 = vmax.f32 %v702_v63, 0.0  ;;  %v1799_v2 = vpop.f32.mrb[72].mxu1 }
 0x25f   :  { %v1800_v3 = vpop.f32.mrb[73].mxu1 }
 0x260   :  { %v794_v4 = vpack.c.bf16 %v772_v1, %v771_v0  ;;  %v1801_v5 = vadd.f32 %v1800_v3, %v1799_v2  ;;  %v1802_v6 = vpop.f32.mrb[74].mxu1 }
 0x261   :  { %v1803_v7 = vpop.f32.mrb[75].mxu1 }
 0x262   :  { %2052 = vmatmul.mubr.bf16.gmra.mrb[16].mxu0 %v794_v4  ;;  %v707_v8 = vadd.f32 %v1801_v5, %v2601_v51  ;;  %v1804_v9 = vadd.f32 %v1803_v7, %v1802_v6 }
 0x264   :  { %v710_v11 = vadd.f32 %v1804_v9, %v2601_v51  ;;  %v773_v13 = vmax.f32 %v707_v8, 0.0 }
 0x266   :  { %v774_v14 = vmax.f32 %v710_v11, 0.0  ;;  %v1805_v38 = vpop.f32.mrb[76].mxu1 }
 0x267   :  { %v1806_v39 = vpop.f32.mrb[77].mxu1 }
 0x268   :  { %v1807_v42 = vadd.f32 %v1806_v39, %v1805_v38  ;;  %v1808_v43 = vpop.f32.mrb[78].mxu1  ;;  %v795_v49 = vpack.c.bf16 %v774_v14, %v773_v13 }
 0x269   :  { %v1809_v50 = vpop.f32.mrb[79].mxu1 }
 0x26a   :  { %v715_v52 = vadd.f32 %v1807_v42, %v2601_v51  ;;  %v1810_v53 = vadd.f32 %v1809_v50, %v1808_v43  ;;  %2055 = vmatprep.mubr.bf16.mxu0 %v795_v49 }
 0x26c   :  { %v718_v54 = vadd.f32 %v1810_v53, %v2601_v51  ;;  %v775_v55 = vmax.f32 %v715_v52, 0.0 }
 0x26e   :  { %v776_v56 = vmax.f32 %v718_v54, 0.0  ;;  %v1811_v57 = vpop.f32.mrb[80].mxu1 }
 0x26f   :  { %v1812_v58 = vpop.f32.mrb[81].mxu1 }
 0x270   :  { %v796_v59 = vpack.c.bf16 %v776_v56, %v775_v55  ;;  %v1813_v60 = vadd.f32 %v1812_v58, %v1811_v57  ;;  %v1814_v61 = vpop.f32.mrb[82].mxu1 }
 0x271   :  { %v1815_v62 = vpop.f32.mrb[83].mxu1 }
 0x272   :  { %2056 = vmatmul.mubr.bf16.gmra.mrb[20].mxu0 %v796_v59  ;;  %v723_v63 = vadd.f32 %v1813_v60, %v2601_v51  ;;  %v1816_v0 = vadd.f32 %v1815_v62, %v1814_v61 }
 0x274   :  { %v726_v1 = vadd.f32 %v1816_v0, %v2601_v51  ;;  %v777_v2 = vmax.f32 %v723_v63, 0.0 }
 0x276   :  { %v778_v3 = vmax.f32 %v726_v1, 0.0  ;;  %v1817_v4 = vpop.f32.mrb[84].mxu1 }
 0x277   :  { %v1818_v5 = vpop.f32.mrb[85].mxu1 }
 0x278   :  { %v1819_v6 = vadd.f32 %v1818_v5, %v1817_v4  ;;  %v1820_v7 = vpop.f32.mrb[86].mxu1  ;;  %v797_v8 = vpack.c.bf16 %v778_v3, %v777_v2 }
 0x279   :  { %v1821_v9 = vpop.f32.mrb[87].mxu1 }
 0x27a   :  { %v731_v11 = vadd.f32 %v1819_v6, %v2601_v51  ;;  %v1822_v13 = vadd.f32 %v1821_v9, %v1820_v7  ;;  %2059 = vmatprep.mubr.bf16.mxu0 %v797_v8 }
 0x27c   :  { %v734_v14 = vadd.f32 %v1822_v13, %v2601_v51  ;;  %v779_v38 = vmax.f32 %v731_v11, 0.0 }
 0x27e   :  { %v780_v39 = vmax.f32 %v734_v14, 0.0  ;;  %v1823_v42 = vpop.f32.mrb[88].mxu1 }
 0x27f   :  { %v1824_v43 = vpop.f32.mrb[89].mxu1 }
 0x280   :  { %v798_v49 = vpack.c.bf16 %v780_v39, %v779_v38  ;;  %v1825_v50 = vadd.f32 %v1824_v43, %v1823_v42  ;;  %v1826_v52 = vpop.f32.mrb[90].mxu1 }
 0x281   :  { %v1827_v53 = vpop.f32.mrb[91].mxu1 }
 0x282   :  { %2060 = vmatmul.mubr.bf16.gmra.mrb[24].mxu0 %v798_v49  ;;  %v739_v54 = vadd.f32 %v1825_v50, %v2601_v51  ;;  %v1828_v55 = vadd.f32 %v1827_v53, %v1826_v52 }
 0x284   :  { %v742_v56 = vadd.f32 %v1828_v55, %v2601_v51  ;;  %v781_v57 = vmax.f32 %v739_v54, 0.0 }
 0x286   :  { %v782_v58 = vmax.f32 %v742_v56, 0.0  ;;  %v1829_v59 = vpop.f32.mrb[92].mxu1 }
 0x287   :  { %v1830_v60 = vpop.f32.mrb[93].mxu1 }
 0x288   :  { %v1831_v61 = vadd.f32 %v1830_v60, %v1829_v59  ;;  %v1832_v62 = vpop.f32.mrb[94].mxu1  ;;  %v799_v63 = vpack.c.bf16 %v782_v58, %v781_v57 }
 0x289   :  { %v1833_v0 = vpop.f32.mrb[95].mxu1 }
 0x28a   :  { %v747_v1 = vadd.f32 %v1831_v61, %v2601_v51  ;;  %v1834_v2 = vadd.f32 %v1833_v0, %v1832_v62  ;;  %2063 = vmatprep.mubr.bf16.mxu0 %v799_v63 }
 0x28c   :  { %v750_v3 = vadd.f32 %v1834_v2, %v2601_v51  ;;  %v783_v4 = vmax.f32 %v747_v1, 0.0 }
 0x28e   :  { %v784_v5 = vmax.f32 %v750_v3, 0.0 }
 0x290   :  { %v800_v6 = vpack.c.bf16 %v784_v5, %v783_v4 }
 0x292   :  { %2064 = vmatmul.mubr.bf16.gmra.mrb[28].mxu0 %v800_v6 }
 0x293   :  { %1081 = vmatprep.mubr.bf16.mxu0 %v2385_v24 }
 0x2f5   :  { %v2037_v7 = vpop.f32.mrb[0].mxu0 }
 0x2f6   :  { %v899_v8 = vpop.f32.mrb[1].mxu0 }
 0x2f7   :  { %v2038_v9 = vpop.f32.mrb[2].mxu0 }
 0x2f8   :  { %v1027_v11 = vpack.c.bf16 %v2038_v9, %v2037_v7  ;;  %v902_v13 = vpop.f32.mrb[3].mxu0 }
 0x2f9   :  { %v1026_v14 = vpack.c.bf16 %v902_v13, %v899_v8 }
 0x305   :  { %v2041_v38 = vpop.f32.mrb[4].mxu0 }
 0x306   :  { %v915_v39 = vpop.f32.mrb[5].mxu0 }
 0x307   :  { %v2042_v42 = vpop.f32.mrb[6].mxu0 }
 0x308   :  { %v1029_v43 = vpack.c.bf16 %v2042_v42, %v2041_v38  ;;  %v918_v49 = vpop.f32.mrb[7].mxu0 }
 0x309   :  { %v1028_v50 = vpack.c.bf16 %v918_v49, %v915_v39 }
 0x315   :  { %v2045_v52 = vpop.f32.mrb[8].mxu0 }
 0x316   :  { %v931_v51 = vpop.f32.mrb[9].mxu0 }
 0x317   :  { %v2046_v53 = vpop.f32.mrb[10].mxu0 }
 0x318   :  { %v1031_v54 = vpack.c.bf16 %v2046_v53, %v2045_v52  ;;  %v934_v55 = vpop.f32.mrb[11].mxu0 }
 0x319   :  { %v1030_v56 = vpack.c.bf16 %v934_v55, %v931_v51 }
 0x325   :  { %v2049_v57 = vpop.f32.mrb[12].mxu0 }
 0x326   :  { %v947_v24 = vpop.f32.mrb[13].mxu0 }
 0x327   :  { %v2050_v58 = vpop.f32.mrb[14].mxu0 }
 0x328   :  { %v1033_v59 = vpack.c.bf16 %v2050_v58, %v2049_v57  ;;  %v950_v60 = vpop.f32.mrb[15].mxu0 }
 0x329   :  { %v1032_v61 = vpack.c.bf16 %v950_v60, %v947_v24 }
 0x335   :  { %v2053_v62 = vpop.f32.mrb[16].mxu0 }
 0x336   :  { %v963_v63 = vpop.f32.mrb[17].mxu0 }
 0x337   :  { %v2054_v0 = vpop.f32.mrb[18].mxu0 }
 0x338   :  { %v1035_v1 = vpack.c.bf16 %v2054_v0, %v2053_v62  ;;  %v966_v2 = vpop.f32.mrb[19].mxu0 }
 0x339   :  { %v1034_v3 = vpack.c.bf16 %v966_v2, %v963_v63 }
 0x33b   :  { %1859 = vmatprep.subr.bf16.mxu0 %v1034_v3 }
 0x33c   :  { %1860 = vmatpush3.bf16.msra.mxu0 %v1026_v14 }
 0x33d   :  { %1861 = vmatprep.subr.bf16.mxu0 %v1035_v1 }
 0x340   :  { %1862 = vmatpush3.bf16.msra.mxu0 %v1027_v11 }
 0x345   :  { %v2057_v4 = vpop.f32.mrb[20].mxu0 }
 0x346   :  { %v979_v5 = vpop.f32.mrb[21].mxu0 }
 0x347   :  { %v2058_v6 = vpop.f32.mrb[22].mxu0 }
 0x348   :  { %v1037_v7 = vpack.c.bf16 %v2058_v6, %v2057_v4  ;;  %v982_v8 = vpop.f32.mrb[23].mxu0 }
 0x349   :  { %v1036_v9 = vpack.c.bf16 %v982_v8, %v979_v5 }
 0x34b   :  { %1863 = vmatprep.subr.bf16.mxu0 %v1036_v9 }
 0x34c   :  { %1864 = vmatpush3.bf16.msra.mxu0 %v1028_v50 }
 0x34d   :  { %1865 = vmatprep.subr.bf16.mxu0 %v1037_v7 }
 0x350   :  { %1866 = vmatpush3.bf16.msra.mxu0 %v1029_v43 }
 0x355   :  { %v2061_v13 = vpop.f32.mrb[24].mxu0 }
 0x356   :  { %v995_v38 = vpop.f32.mrb[25].mxu0 }
 0x357   :  { %v2062_v39 = vpop.f32.mrb[26].mxu0 }
 0x358   :  { %v1039_v42 = vpack.c.bf16 %v2062_v39, %v2061_v13  ;;  %v998_v49 = vpop.f32.mrb[27].mxu0 }
 0x359   :  { %v1038_v52 = vpack.c.bf16 %v998_v49, %v995_v38 }
 0x35b   :  { %1867 = vmatprep.subr.bf16.mxu0 %v1038_v52 }
 0x35c   :  { %1868 = vmatpush3.bf16.msra.mxu0 %v1030_v56 }
 0x35d   :  { %1869 = vmatprep.subr.bf16.mxu0 %v1039_v42 }
 0x360   :  { %1870 = vmatpush3.bf16.msra.mxu0 %v1031_v54 }
 0x365   :  { %v2065_v11 = vpop.f32.mrb[28].mxu0 }
 0x366   :  { %v1011_v14 = vpop.f32.mrb[29].mxu0 }
 0x367   :  { %v2066_v51 = vpop.f32.mrb[30].mxu0 }
 0x368   :  { %v1041_v53 = vpack.c.bf16 %v2066_v51, %v2065_v11  ;;  %v1014_v55 = vpop.f32.mrb[31].mxu0 }
 0x369   :  { %v1040_v57 = vpack.c.bf16 %v1014_v55, %v1011_v14 }
 0x36b   :  { %1871 = vmatprep.subr.bf16.mxu0 %v1040_v57 }
 0x36c   :  { %1872 = vmatpush3.bf16.msra.mxu0 %v1032_v61 }
 0x36d   :  { %1873 = vmatprep.subr.bf16.mxu0 %v1041_v53 }
 0x370   :  { %1874 = vmatpush3.bf16.msra.mxu0 %v1033_v59 }
 0x373   :  { %1082 = vmatmul.mubr.bf16.vlgmr.msra.gmra.mrb[32].mxu0 %v2394_v10  ;;  %v1210_v10 = vlaneseq }
 0x374   :  { %1089 = vmatprep.mubr.bf16.mxu0 %v2402_v12 }
 0x375   :  { %v2667_v12 = vand.u32 127, %v1210_v10 }
 0x377   :  { %vm1212_vm0 = vcmp.lt.s32.totalorder %v2667_v12, 4 }
 0x37b   :  { %1090 = vmatmul.mubr.bf16.gmra.mrb[36].mxu0 %v2415_v15 }
 0x37c   :  { %1097 = vmatprep.mubr.bf16.mxu0 %v2420_v16 }
 0x383   :  { %1098 = vmatmul.mubr.bf16.gmra.mrb[40].mxu0 %v2427_v17  ;;  %v2672_v17 = vld [vmem:[%s3192_s5] ss:$0 sm:$0xff] }
 0x384   :  { %1105 = vmatprep.mubr.bf16.mxu0 %v2432_v18 }
 0x38b   :  { %1106 = vmatmul.mubr.bf16.gmra.mrb[44].mxu0 %v2439_v19 }
 0x38c   :  { %1113 = vmatprep.mubr.bf16.mxu0 %v2444_v20 }
 0x393   :  { %1114 = vmatmul.mubr.bf16.gmra.mrb[48].mxu0 %v2451_v21 }
 0x394   :  { %1121 = vmatprep.mubr.bf16.mxu0 %v2456_v22 }
 0x39b   :  { %1122 = vmatmul.mubr.bf16.gmra.mrb[52].mxu0 %v2463_v23 }
 0x39c   :  { %1129 = vmatprep.mubr.bf16.mxu0 %v2468_v25 }
 0x3a3   :  { %1130 = vmatmul.mubr.bf16.gmra.mrb[56].mxu0 %v2475_v26 }
 0x3a4   :  { %1137 = vmatprep.mubr.bf16.mxu0 %v2480_v27 }
 0x3ab   :  { %1138 = vmatmul.mubr.bf16.gmra.mrb[60].mxu0 %v2487_v28 }
 0x3ac   :  { %1145 = vmatprep.mubr.bf16.mxu0 %v2492_v29 }
 0x3b3   :  { %1146 = vmatmul.mubr.bf16.gmra.mrb[64].mxu0 %v2499_v30 }
 0x3b4   :  { %1153 = vmatprep.mubr.bf16.mxu0 %v2504_v31 }
 0x3bb   :  { %1154 = vmatmul.mubr.bf16.gmra.mrb[68].mxu0 %v2511_v32 }
 0x3bc   :  { %1161 = vmatprep.mubr.bf16.mxu0 %v2516_v33 }
 0x3c3   :  { %1162 = vmatmul.mubr.bf16.gmra.mrb[72].mxu0 %v2523_v34 }
 0x3c4   :  { %1169 = vmatprep.mubr.bf16.mxu0 %v2528_v35 }
 0x3cb   :  { %1170 = vmatmul.mubr.bf16.gmra.mrb[76].mxu0 %v2535_v36 }
 0x3cc   :  { %1177 = vmatprep.mubr.bf16.mxu0 %v2540_v37 }
 0x3d3   :  { %1178 = vmatmul.mubr.bf16.gmra.mrb[80].mxu0 %v2553_v40 }
 0x3d4   :  { %1185 = vmatprep.mubr.bf16.mxu0 %v2558_v41 }
 0x3db   :  { %1186 = vmatmul.mubr.bf16.gmra.mrb[84].mxu0 %v2571_v44 }
 0x3dc   :  { %1193 = vmatprep.mubr.bf16.mxu0 %v2576_v45 }
 0x3e3   :  { %1194 = vmatmul.mubr.bf16.gmra.mrb[88].mxu0 %v2583_v46 }
 0x3e4   :  { %1201 = vmatprep.mubr.bf16.mxu0 %v2588_v47 }
 0x3eb   :  { %1202 = vmatmul.mubr.bf16.gmra.mrb[92].mxu0 %v2595_v48 }
 0x446   :  { %v1875_v15 = vpop.f32.mrb[32].mxu0 }
 0x447   :  { %v1876_v16 = vpop.f32.mrb[33].mxu0 }
 0x448   :  { %v1877_v18 = vadd.f32 %v1876_v16, %v1875_v15  ;;  %v1878_v19 = vpop.f32.mrb[34].mxu0 }
 0x449   :  { %v1879_v20 = vpop.f32.mrb[35].mxu0 }
 0x44a   :  { %v1880_v21 = vadd.f32 %v1879_v20, %v1878_v19  ;;  %v1084_v22 = vadd.f32 %v1877_v18, %v2672_v17 }
 0x44c   :  { %v2678_v23 = vsel %vm1212_vm0, %v1084_v22, -1e+30  ;;  %v1087_v25 = vadd.f32 %v1880_v21, %v2672_v17 }
 0x44d   :  { %1245 = vmax.xlane.f32.xlu0 %v2678_v23 }
 0x44e   :  { %v1881_v26 = vpop.f32.mrb[36].mxu0  ;;  %v2684_v29 = vsel %vm1212_vm0, %v1087_v25, -1e+30 }
 0x44f   :  { %v1882_v27 = vpop.f32.mrb[37].mxu0 }
 0x450   :  { %v1883_v28 = vadd.f32 %v1882_v27, %v1881_v26  ;;  %v1884_v30 = vpop.f32.mrb[38].mxu0 }
 0x451   :  { %1247 = vmax.xlane.f32.xlu0 %v2684_v29  ;;  %v1885_v31 = vpop.f32.mrb[39].mxu0 }
 0x452   :  { %v1886_v32 = vadd.f32 %v1885_v31, %v1884_v30  ;;  %v1092_v33 = vadd.f32 %v1883_v28, %v2672_v17 }
 0x454   :  { %v2690_v34 = vsel %vm1212_vm0, %v1092_v33, -1e+30  ;;  %v1095_v35 = vadd.f32 %v1886_v32, %v2672_v17 }
 0x455   :  { %1249 = vmax.xlane.f32.xlu1 %v2690_v34 }
 0x456   :  { %v1887_v36 = vpop.f32.mrb[40].mxu0  ;;  %v2696_v44 = vsel %vm1212_vm0, %v1095_v35, -1e+30 }
 0x457   :  { %v1888_v37 = vpop.f32.mrb[41].mxu0 }
 0x458   :  { %v1889_v40 = vadd.f32 %v1888_v37, %v1887_v36  ;;  %v1890_v41 = vpop.f32.mrb[42].mxu0 }
 0x459   :  { %v1891_v45 = vpop.f32.mrb[43].mxu0  ;;  %1251 = vmax.xlane.f32.xlu1 %v2696_v44 }
 0x45a   :  { %v1892_v46 = vadd.f32 %v1891_v45, %v1890_v41  ;;  %v1100_v47 = vadd.f32 %v1889_v40, %v2672_v17 }
 0x45c   :  { %v2702_v48 = vsel %vm1212_vm0, %v1100_v47, -1e+30  ;;  %v1103_v43 = vadd.f32 %v1892_v46, %v2672_v17 }
 0x45d   :  { %1253 = vmax.xlane.f32.xlu0 %v2702_v48 }
 0x45e   :  { %v1893_v50 = vpop.f32.mrb[44].mxu0  ;;  %v2708_v54 = vsel %vm1212_vm0, %v1103_v43, -1e+30 }
 0x45f   :  { %v1894_v56 = vpop.f32.mrb[45].mxu0  ;;  %1255 = vmax.xlane.f32.xlu1 %v2708_v54 }
 0x460   :  { %v1895_v24 = vadd.f32 %v1894_v56, %v1893_v50  ;;  %v1896_v58 = vpop.f32.mrb[46].mxu0 }
 0x461   :  { %v1897_v59 = vpop.f32.mrb[47].mxu0 }
 0x462   :  { %v1898_v60 = vadd.f32 %v1897_v59, %v1896_v58  ;;  %v1108_v61 = vadd.f32 %v1895_v24, %v2672_v17 }
 0x464   :  { %v2714_v62 = vsel %vm1212_vm0, %v1108_v61, -1e+30  ;;  %v1111_v63 = vadd.f32 %v1898_v60, %v2672_v17 }
 0x465   :  { %1257 = vmax.xlane.f32.xlu0 %v2714_v62 }
 0x466   :  { %v1899_v0 = vpop.f32.mrb[48].mxu0  ;;  %v2720_v1 = vsel %vm1212_vm0, %v1111_v63, -1e+30 }
 0x467   :  { %v1900_v2 = vpop.f32.mrb[49].mxu0  ;;  %1259 = vmax.xlane.f32.xlu1 %v2720_v1 }
 0x468   :  { %v1901_v3 = vadd.f32 %v1900_v2, %v1899_v0  ;;  %v1902_v4 = vpop.f32.mrb[50].mxu0 }
 0x469   :  { %v1903_v5 = vpop.f32.mrb[51].mxu0 }
 0x46a   :  { %v1904_v6 = vadd.f32 %v1903_v5, %v1902_v4  ;;  %v1116_v7 = vadd.f32 %v1901_v3, %v2672_v17 }
 0x46c   :  { %v2726_v8 = vsel %vm1212_vm0, %v1116_v7, -1e+30  ;;  %v1119_v9 = vadd.f32 %v1904_v6, %v2672_v17 }
 0x46d   :  { %1261 = vmax.xlane.f32.xlu0 %v2726_v8 }
 0x46e   :  { %v1905_v13 = vpop.f32.mrb[52].mxu0  ;;  %v2732_v38 = vsel %vm1212_vm0, %v1119_v9, -1e+30 }
 0x46f   :  { %v1906_v39 = vpop.f32.mrb[53].mxu0  ;;  %1263 = vmax.xlane.f32.xlu1 %v2732_v38 }
 0x470   :  { %v1907_v42 = vadd.f32 %v1906_v39, %v1905_v13  ;;  %v1908_v49 = vpop.f32.mrb[54].mxu0 }
 0x471   :  { %v1909_v52 = vpop.f32.mrb[55].mxu0 }
 0x472   :  { %v1910_v11 = vadd.f32 %v1909_v52, %v1908_v49  ;;  %v1124_v14 = vadd.f32 %v1907_v42, %v2672_v17 }
 0x474   :  { %v2738_v51 = vsel %vm1212_vm0, %v1124_v14, -1e+30  ;;  %v1127_v53 = vadd.f32 %v1910_v11, %v2672_v17 }
 0x475   :  { %1265 = vmax.xlane.f32.xlu0 %v2738_v51 }
 0x476   :  { %v1911_v55 = vpop.f32.mrb[56].mxu0  ;;  %v2744_v57 = vsel %vm1212_vm0, %v1127_v53, -1e+30 }
 0x477   :  { %v1912_v10 = vpop.f32.mrb[57].mxu0  ;;  %1267 = vmax.xlane.f32.xlu1 %v2744_v57 }
 0x478   :  { %v1913_v15 = vadd.f32 %v1912_v10, %v1911_v55  ;;  %v1914_v16 = vpop.f32.mrb[58].mxu0 }
 0x479   :  { %v1915_v18 = vpop.f32.mrb[59].mxu0 }
 0x47a   :  { %v1916_v19 = vadd.f32 %v1915_v18, %v1914_v16  ;;  %v1132_v20 = vadd.f32 %v1913_v15, %v2672_v17 }
 0x47c   :  { %v2750_v21 = vsel %vm1212_vm0, %v1132_v20, -1e+30  ;;  %v1135_v22 = vadd.f32 %v1916_v19, %v2672_v17 }
 0x47d   :  { %1269 = vmax.xlane.f32.xlu0 %v2750_v21 }
 0x47e   :  { %v1917_v25 = vpop.f32.mrb[60].mxu0  ;;  %v2756_v26 = vsel %vm1212_vm0, %v1135_v22, -1e+30 }
 0x47f   :  { %v1918_v27 = vpop.f32.mrb[61].mxu0  ;;  %1271 = vmax.xlane.f32.xlu1 %v2756_v26 }
 0x480   :  { %v1919_v28 = vadd.f32 %v1918_v27, %v1917_v25  ;;  %v1920_v30 = vpop.f32.mrb[62].mxu0 }
 0x481   :  { %v1921_v31 = vpop.f32.mrb[63].mxu0 }
 0x482   :  { %v1922_v32 = vadd.f32 %v1921_v31, %v1920_v30  ;;  %v1140_v33 = vadd.f32 %v1919_v28, %v2672_v17 }
 0x484   :  { %v2762_v35 = vsel %vm1212_vm0, %v1140_v33, -1e+30  ;;  %v1143_v36 = vadd.f32 %v1922_v32, %v2672_v17 }
 0x485   :  { %1273 = vmax.xlane.f32.xlu0 %v2762_v35 }
 0x486   :  { %v1923_v37 = vpop.f32.mrb[64].mxu0  ;;  %v2768_v40 = vsel %vm1212_vm0, %v1143_v36, -1e+30 }
 0x487   :  { %v1924_v41 = vpop.f32.mrb[65].mxu0  ;;  %1275 = vmax.xlane.f32.xlu1 %v2768_v40 }
 0x488   :  { %v1925_v45 = vadd.f32 %v1924_v41, %v1923_v37  ;;  %v1926_v46 = vpop.f32.mrb[66].mxu0 }
 0x489   :  { %v1927_v47 = vpop.f32.mrb[67].mxu0 }
 0x48a   :  { %v1928_v43 = vadd.f32 %v1927_v47, %v1926_v46  ;;  %v1148_v50 = vadd.f32 %v1925_v45, %v2672_v17 }
 0x48c   :  { %v2774_v56 = vsel %vm1212_vm0, %v1148_v50, -1e+30  ;;  %v1151_v24 = vadd.f32 %v1928_v43, %v2672_v17 }
 0x48d   :  { %1277 = vmax.xlane.f32.xlu0 %v2774_v56 }
 0x48e   :  { %v1929_v58 = vpop.f32.mrb[68].mxu0  ;;  %v2780_v59 = vsel %vm1212_vm0, %v1151_v24, -1e+30 }
 0x48f   :  { %v1930_v60 = vpop.f32.mrb[69].mxu0  ;;  %1279 = vmax.xlane.f32.xlu1 %v2780_v59 }
 0x490   :  { %v1931_v61 = vadd.f32 %v1930_v60, %v1929_v58  ;;  %v1932_v63 = vpop.f32.mrb[70].mxu0 }
 0x491   :  { %v1933_v0 = vpop.f32.mrb[71].mxu0 }
 0x492   :  { %v1934_v2 = vadd.f32 %v1933_v0, %v1932_v63  ;;  %v1156_v3 = vadd.f32 %v1931_v61, %v2672_v17 }
 0x494   :  { %v2786_v4 = vsel %vm1212_vm0, %v1156_v3, -1e+30  ;;  %v1159_v5 = vadd.f32 %v1934_v2, %v2672_v17 }
 0x495   :  { %1281 = vmax.xlane.f32.xlu0 %v2786_v4 }
 0x496   :  { %v1935_v6 = vpop.f32.mrb[72].mxu0  ;;  %v2792_v7 = vsel %vm1212_vm0, %v1159_v5, -1e+30 }
 0x497   :  { %v1936_v9 = vpop.f32.mrb[73].mxu0  ;;  %1283 = vmax.xlane.f32.xlu1 %v2792_v7 }
 0x498   :  { %v1937_v13 = vadd.f32 %v1936_v9, %v1935_v6  ;;  %v1938_v39 = vpop.f32.mrb[74].mxu0 }
 0x499   :  { %v1939_v42 = vpop.f32.mrb[75].mxu0 }
 0x49a   :  { %v1940_v49 = vadd.f32 %v1939_v42, %v1938_v39  ;;  %v1164_v52 = vadd.f32 %v1937_v13, %v2672_v17 }
 0x49c   :  { %v2798_v11 = vsel %vm1212_vm0, %v1164_v52, -1e+30  ;;  %v1167_v14 = vadd.f32 %v1940_v49, %v2672_v17 }
 0x49d   :  { %1285 = vmax.xlane.f32.xlu0 %v2798_v11 }
 0x49e   :  { %v1941_v53 = vpop.f32.mrb[76].mxu0  ;;  %v2804_v55 = vsel %vm1212_vm0, %v1167_v14, -1e+30 }
 0x49f   :  { %v1942_v10 = vpop.f32.mrb[77].mxu0  ;;  %1287 = vmax.xlane.f32.xlu1 %v2804_v55 }
 0x4a0   :  { %v1943_v15 = vadd.f32 %v1942_v10, %v1941_v53  ;;  %v1944_v16 = vpop.f32.mrb[78].mxu0 }
 0x4a1   :  { %v1945_v18 = vpop.f32.mrb[79].mxu0 }
 0x4a2   :  { %v1946_v19 = vadd.f32 %v1945_v18, %v1944_v16  ;;  %v1172_v20 = vadd.f32 %v1943_v15, %v2672_v17 }
 0x4a4   :  { %v2810_v22 = vsel %vm1212_vm0, %v1172_v20, -1e+30  ;;  %v1175_v25 = vadd.f32 %v1946_v19, %v2672_v17 }
 0x4a5   :  { %1289 = vmax.xlane.f32.xlu0 %v2810_v22 }
 0x4a6   :  { %v1947_v27 = vpop.f32.mrb[80].mxu0  ;;  %v2816_v28 = vsel %vm1212_vm0, %v1175_v25, -1e+30 }
 0x4a7   :  { %v1948_v30 = vpop.f32.mrb[81].mxu0  ;;  %1291 = vmax.xlane.f32.xlu1 %v2816_v28 }
 0x4a8   :  { %v1949_v31 = vadd.f32 %v1948_v30, %v1947_v27  ;;  %v1950_v32 = vpop.f32.mrb[82].mxu0 }
 0x4a9   :  { %v1951_v33 = vpop.f32.mrb[83].mxu0 }
 0x4aa   :  { %v1952_v36 = vadd.f32 %v1951_v33, %v1950_v32  ;;  %v1180_v37 = vadd.f32 %v1949_v31, %v2672_v17 }
 0x4ac   :  { %v2822_v41 = vsel %vm1212_vm0, %v1180_v37, -1e+30  ;;  %v1183_v45 = vadd.f32 %v1952_v36, %v2672_v17 }
 0x4ad   :  { %1293 = vmax.xlane.f32.xlu0 %v2822_v41 }
 0x4ae   :  { %v1953_v46 = vpop.f32.mrb[84].mxu0  ;;  %v2828_v47 = vsel %vm1212_vm0, %v1183_v45, -1e+30 }
 0x4af   :  { %v1954_v43 = vpop.f32.mrb[85].mxu0  ;;  %1295 = vmax.xlane.f32.xlu1 %v2828_v47 }
 0x4b0   :  { %v1955_v50 = vadd.f32 %v1954_v43, %v1953_v46  ;;  %v1956_v24 = vpop.f32.mrb[86].mxu0 }
 0x4b1   :  { %v1957_v58 = vpop.f32.mrb[87].mxu0 }
 0x4b2   :  { %v1958_v60 = vadd.f32 %v1957_v58, %v1956_v24  ;;  %v1188_v61 = vadd.f32 %v1955_v50, %v2672_v17 }
 0x4b4   :  { %v2834_v63 = vsel %vm1212_vm0, %v1188_v61, -1e+30  ;;  %v1191_v0 = vadd.f32 %v1958_v60, %v2672_v17 }
 0x4b5   :  { %1297 = vmax.xlane.f32.xlu0 %v2834_v63 }
 0x4b6   :  { %v1959_v2 = vpop.f32.mrb[88].mxu0  ;;  %v2840_v3 = vsel %vm1212_vm0, %v1191_v0, -1e+30 }
 0x4b7   :  { %v1960_v5 = vpop.f32.mrb[89].mxu0  ;;  %1299 = vmax.xlane.f32.xlu1 %v2840_v3 }
 0x4b8   :  { %v1961_v6 = vadd.f32 %v1960_v5, %v1959_v2  ;;  %v1962_v9 = vpop.f32.mrb[90].mxu0 }
 0x4b9   :  { %v1963_v13 = vpop.f32.mrb[91].mxu0 }
 0x4ba   :  { %v1964_v39 = vadd.f32 %v1963_v13, %v1962_v9  ;;  %v1196_v42 = vadd.f32 %v1961_v6, %v2672_v17 }
 0x4bc   :  { %v2846_v49 = vsel %vm1212_vm0, %v1196_v42, -1e+30  ;;  %v1199_v52 = vadd.f32 %v1964_v39, %v2672_v17 }
 0x4bd   :  { %1301 = vmax.xlane.f32.xlu0 %v2846_v49 }
 0x4be   :  { %v1965_v14 = vpop.f32.mrb[92].mxu0  ;;  %v2852_v53 = vsel %vm1212_vm0, %v1199_v52, -1e+30 }
 0x4bf   :  { %v1966_v10 = vpop.f32.mrb[93].mxu0  ;;  %1303 = vmax.xlane.f32.xlu1 %v2852_v53 }
 0x4c0   :  { %v1967_v15 = vadd.f32 %v1966_v10, %v1965_v14  ;;  %v1968_v16 = vpop.f32.mrb[94].mxu0 }
 0x4c1   :  { %v1969_v18 = vpop.f32.mrb[95].mxu0 }
 0x4c2   :  { %v1970_v19 = vadd.f32 %v1969_v18, %v1968_v16  ;;  %v1204_v20 = vadd.f32 %v1967_v15, %v2672_v17 }
 0x4c4   :  { %v2858_v25 = vsel %vm1212_vm0, %v1204_v20, -1e+30  ;;  %v1207_v27 = vadd.f32 %v1970_v19, %v2672_v17 }
 0x4c5   :  { %1305 = vmax.xlane.f32.xlu0 %v2858_v25 }
 0x4c6   :  { %v2864_v30 = vsel %vm1212_vm0, %v1207_v27, -1e+30 }
 0x4c7   :  { %1307 = vmax.xlane.f32.xlu1 %v2864_v30 }
 0x4da   :  { %v1246_v31 = vpop.xlane.xlu0 %1245 }
 0x4db   :  { %v2868_v32 = vsub.f32 %v2678_v23, %v1246_v31 }
 0x4dd   :  { %v1341_v33 = vmul.f32 1.442695, %v2868_v32 }
 0x4de   :  { %v1248_v36 = vpop.xlane.xlu0 %1247 }
 0x4df   :  { %2147 = vpow2.f32 %v1341_v33  ;;  %v2872_v37 = vsub.f32 %v2684_v29, %v1248_v36 }
 0x4e1   :  { %v1343_v17 = vmul.f32 1.442695, %v2872_v37 }
 0x4e2   :  { %v1250_v45 = vpop.xlane.xlu1 %1249 }
 0x4e3   :  { %2149 = vpow2.f32 %v1343_v17  ;;  %v2876_v46 = vsub.f32 %v2690_v34, %v1250_v45 }
 0x4e5   :  { %v1345_v43 = vmul.f32 1.442695, %v2876_v46 }
 0x4e6   :  { %v1252_v50 = vpop.xlane.xlu1 %1251 }
 0x4e7   :  { %2151 = vpow2.f32 %v1345_v43  ;;  %v2880_v23 = vsub.f32 %v2696_v44, %v1252_v50 }
 0x4e9   :  { %v2148_v24 = vpop.eup %2147  ;;  %v1347_v58 = vmul.f32 1.442695, %v2880_v23 }
 0x4ea   :  { %v1254_v60 = vpop.xlane.xlu0 %1253  ;;  %v1405_v29 = vsel %vm1212_vm0, %v2148_v24, 0.0 }
 0x4eb   :  { %2153 = vpow2.f32 %v1347_v58  ;;  %v2886_v61 = vsub.f32 %v2702_v48, %v1254_v60  ;;  %1437 = vadd.xlane.f32.xlu0 %v1405_v29 }
 0x4ec   :  { %v1256_v34 = vpop.xlane.xlu1 %1255 }
 0x4ed   :  { %v2150_v0 = vpop.eup %2149  ;;  %v1349_v2 = vmul.f32 1.442695, %v2886_v61  ;;  %v2890_v5 = vsub.f32 %v2708_v54, %v1256_v34 }
 0x4ee   :  { %v1406_v44 = vsel %vm1212_vm0, %v2150_v0, 0.0 }
 0x4ef   :  { %2155 = vpow2.f32 %v1349_v2  ;;  %v1351_v6 = vmul.f32 1.442695, %v2890_v5  ;;  %1439 = vadd.xlane.f32.xlu1 %v1406_v44 }
 0x4f1   :  { %v2152_v9 = vpop.eup %2151  ;;  %2157 = vpow2.f32 %v1351_v6 }
 0x4f2   :  { %v1258_v13 = vpop.xlane.xlu0 %1257  ;;  %v1407_v48 = vsel %vm1212_vm0, %v2152_v9, 0.0 }
 0x4f3   :  { %v2898_v39 = vsub.f32 %v2714_v62, %v1258_v13  ;;  %1441 = vadd.xlane.f32.xlu0 %v1407_v48 }
 0x4f4   :  { %v1260_v42 = vpop.xlane.xlu1 %1259 }
 0x4f5   :  { %v2154_v54 = vpop.eup %2153  ;;  %v1353_v52 = vmul.f32 1.442695, %v2898_v39  ;;  %v2902_v14 = vsub.f32 %v2720_v1, %v1260_v42 }
 0x4f6   :  { %v1408_v10 = vsel %vm1212_vm0, %v2154_v54, 0.0 }
 0x4f7   :  { %2159 = vpow2.f32 %v1353_v52  ;;  %v1355_v15 = vmul.f32 1.442695, %v2902_v14  ;;  %1443 = vadd.xlane.f32.xlu1 %v1408_v10 }
 0x4f9   :  { %v2156_v16 = vpop.eup %2155  ;;  %2161 = vpow2.f32 %v1355_v15 }
 0x4fa   :  { %v1262_v18 = vpop.xlane.xlu0 %1261  ;;  %v1409_v62 = vsel %vm1212_vm0, %v2156_v16, 0.0 }
 0x4fb   :  { %v2158_v19 = vpop.eup %2157  ;;  %v2910_v20 = vsub.f32 %v2726_v8, %v1262_v18  ;;  %1445 = vadd.xlane.f32.xlu0 %v1409_v62 }
 0x4fc   :  { %v1264_v1 = vpop.xlane.xlu1 %1263  ;;  %v1410_v27 = vsel %vm1212_vm0, %v2158_v19, 0.0 }
 0x4fd   :  { %v1357_v31 = vmul.f32 1.442695, %v2910_v20  ;;  %v2916_v33 = vsub.f32 %v2732_v38, %v1264_v1  ;;  %1447 = vadd.xlane.f32.xlu1 %v1410_v27 }
 0x4ff   :  { %2163 = vpow2.f32 %v1357_v31  ;;  %v1359_v36 = vmul.f32 1.442695, %v2916_v33 }
 0x501   :  { %v2160_v17 = vpop.eup %2159  ;;  %2165 = vpow2.f32 %v1359_v36 }
 0x502   :  { %v1266_v45 = vpop.xlane.xlu0 %1265  ;;  %v1411_v8 = vsel %vm1212_vm0, %v2160_v17, 0.0 }
 0x503   :  { %v2162_v43 = vpop.eup %2161  ;;  %v2922_v50 = vsub.f32 %v2738_v51, %v1266_v45  ;;  %1449 = vadd.xlane.f32.xlu0 %v1411_v8 }
 0x504   :  { %v1268_v24 = vpop.xlane.xlu1 %1267  ;;  %v1412_v38 = vsel %vm1212_vm0, %v2162_v43, 0.0 }
 0x505   :  { %v1361_v58 = vmul.f32 1.442695, %v2922_v50  ;;  %v2928_v60 = vsub.f32 %v2744_v57, %v1268_v24  ;;  %1451 = vadd.xlane.f32.xlu1 %v1412_v38 }
 0x507   :  { %2167 = vpow2.f32 %v1361_v58  ;;  %v1363_v29 = vmul.f32 1.442695, %v2928_v60 }
 0x509   :  { %v2164_v34 = vpop.eup %2163  ;;  %2169 = vpow2.f32 %v1363_v29 }
 0x50a   :  { %v1270_v0 = vpop.xlane.xlu0 %1269  ;;  %v1413_v51 = vsel %vm1212_vm0, %v2164_v34, 0.0 }
 0x50b   :  { %v2166_v2 = vpop.eup %2165  ;;  %v2934_v44 = vsub.f32 %v2750_v21, %v1270_v0  ;;  %1453 = vadd.xlane.f32.xlu0 %v1413_v51 }
 0x50c   :  { %v1272_v6 = vpop.xlane.xlu1 %1271  ;;  %v1414_v57 = vsel %vm1212_vm0, %v2166_v2, 0.0 }
 0x50d   :  { %v1365_v9 = vmul.f32 1.442695, %v2934_v44  ;;  %v2940_v13 = vsub.f32 %v2756_v26, %v1272_v6  ;;  %1455 = vadd.xlane.f32.xlu1 %v1414_v57 }
 0x50f   :  { %2171 = vpow2.f32 %v1365_v9  ;;  %v1367_v48 = vmul.f32 1.442695, %v2940_v13 }
 0x511   :  { %v2168_v42 = vpop.eup %2167  ;;  %2173 = vpow2.f32 %v1367_v48 }
 0x512   :  { %v1274_v54 = vpop.xlane.xlu0 %1273  ;;  %v1415_v21 = vsel %vm1212_vm0, %v2168_v42, 0.0 }
 0x513   :  { %v2170_v52 = vpop.eup %2169  ;;  %v2946_v10 = vsub.f32 %v2762_v35, %v1274_v54  ;;  %1457 = vadd.xlane.f32.xlu0 %v1415_v21 }
 0x514   :  { %v1276_v15 = vpop.xlane.xlu1 %1275  ;;  %v1416_v26 = vsel %vm1212_vm0, %v2170_v52, 0.0 }
 0x515   :  { %v1369_v16 = vmul.f32 1.442695, %v2946_v10  ;;  %v2952_v18 = vsub.f32 %v2768_v40, %v1276_v15  ;;  %1459 = vadd.xlane.f32.xlu1 %v1416_v26 }
 0x517   :  { %2175 = vpow2.f32 %v1369_v16  ;;  %v1371_v62 = vmul.f32 1.442695, %v2952_v18 }
 0x519   :  { %v2172_v19 = vpop.eup %2171  ;;  %2177 = vpow2.f32 %v1371_v62 }
 0x51a   :  { %v1278_v1 = vpop.xlane.xlu0 %1277  ;;  %v1417_v35 = vsel %vm1212_vm0, %v2172_v19, 0.0 }
 0x51b   :  { %v2174_v27 = vpop.eup %2173  ;;  %v2958_v31 = vsub.f32 %v2774_v56, %v1278_v1  ;;  %1461 = vadd.xlane.f32.xlu0 %v1417_v35 }
 0x51c   :  { %v1280_v36 = vpop.xlane.xlu1 %1279  ;;  %v1418_v40 = vsel %vm1212_vm0, %v2174_v27, 0.0 }
 0x51d   :  { %v1373_v17 = vmul.f32 1.442695, %v2958_v31  ;;  %v2964_v45 = vsub.f32 %v2780_v59, %v1280_v36  ;;  %1463 = vadd.xlane.f32.xlu1 %v1418_v40 }
 0x51f   :  { %2179 = vpow2.f32 %v1373_v17  ;;  %v1375_v8 = vmul.f32 1.442695, %v2964_v45 }
 0x521   :  { %v2176_v43 = vpop.eup %2175  ;;  %2181 = vpow2.f32 %v1375_v8 }
 0x522   :  { %v1282_v24 = vpop.xlane.xlu0 %1281  ;;  %v1419_v56 = vsel %vm1212_vm0, %v2176_v43, 0.0 }
 0x523   :  { %v2178_v38 = vpop.eup %2177  ;;  %v2970_v58 = vsub.f32 %v2786_v4, %v1282_v24  ;;  %1465 = vadd.xlane.f32.xlu0 %v1419_v56 }
 0x524   :  { %v1284_v29 = vpop.xlane.xlu1 %1283  ;;  %v1420_v59 = vsel %vm1212_vm0, %v2178_v38, 0.0 }
 0x525   :  { %v1377_v34 = vmul.f32 1.442695, %v2970_v58  ;;  %v2976_v0 = vsub.f32 %v2792_v7, %v1284_v29  ;;  %1467 = vadd.xlane.f32.xlu1 %v1420_v59 }
 0x527   :  { %2183 = vpow2.f32 %v1377_v34  ;;  %v1379_v51 = vmul.f32 1.442695, %v2976_v0 }
 0x529   :  { %v2180_v2 = vpop.eup %2179  ;;  %2185 = vpow2.f32 %v1379_v51 }
 0x52a   :  { %v1286_v6 = vpop.xlane.xlu0 %1285  ;;  %v1421_v4 = vsel %vm1212_vm0, %v2180_v2, 0.0 }
 0x52b   :  { %v2182_v57 = vpop.eup %2181  ;;  %v2982_v9 = vsub.f32 %v2798_v11, %v1286_v6  ;;  %1469 = vadd.xlane.f32.xlu0 %v1421_v4 }
 0x52c   :  { %v1288_v48 = vpop.xlane.xlu1 %1287  ;;  %v1422_v7 = vsel %vm1212_vm0, %v2182_v57, 0.0 }
 0x52d   :  { %v1381_v42 = vmul.f32 1.442695, %v2982_v9  ;;  %v2988_v54 = vsub.f32 %v2804_v55, %v1288_v48  ;;  %1471 = vadd.xlane.f32.xlu1 %v1422_v7 }
 0x52f   :  { %2187 = vpow2.f32 %v1381_v42  ;;  %v1383_v21 = vmul.f32 1.442695, %v2988_v54 }
 0x531   :  { %v2184_v52 = vpop.eup %2183  ;;  %2189 = vpow2.f32 %v1383_v21 }
 0x532   :  { %v1290_v15 = vpop.xlane.xlu0 %1289  ;;  %v1423_v11 = vsel %vm1212_vm0, %v2184_v52, 0.0 }
 0x533   :  { %v2186_v26 = vpop.eup %2185  ;;  %v2994_v16 = vsub.f32 %v2810_v22, %v1290_v15  ;;  %1473 = vadd.xlane.f32.xlu0 %v1423_v11 }
 0x534   :  { %v1292_v62 = vpop.xlane.xlu1 %1291  ;;  %v1424_v55 = vsel %vm1212_vm0, %v2186_v26, 0.0 }
 0x535   :  { %v1385_v19 = vmul.f32 1.442695, %v2994_v16  ;;  %v3000_v1 = vsub.f32 %v2816_v28, %v1292_v62  ;;  %1475 = vadd.xlane.f32.xlu1 %v1424_v55 }
 0x537   :  { %2191 = vpow2.f32 %v1385_v19  ;;  %v1387_v35 = vmul.f32 1.442695, %v3000_v1 }
 0x539   :  { %v2188_v27 = vpop.eup %2187  ;;  %2193 = vpow2.f32 %v1387_v35 }
 0x53a   :  { %v1294_v36 = vpop.xlane.xlu0 %1293  ;;  %v1425_v22 = vsel %vm1212_vm0, %v2188_v27, 0.0 }
 0x53b   :  { %v2190_v40 = vpop.eup %2189  ;;  %v3006_v17 = vsub.f32 %v2822_v41, %v1294_v36  ;;  %1477 = vadd.xlane.f32.xlu0 %v1425_v22 }
 0x53c   :  { %v1296_v8 = vpop.xlane.xlu1 %1295  ;;  %v1426_v28 = vsel %vm1212_vm0, %v2190_v40, 0.0 }
 0x53d   :  { %v1389_v43 = vmul.f32 1.442695, %v3006_v17  ;;  %v3012_v24 = vsub.f32 %v2828_v47, %v1296_v8  ;;  %1479 = vadd.xlane.f32.xlu1 %v1426_v28 }
 0x53f   :  { %2195 = vpow2.f32 %v1389_v43  ;;  %v1391_v56 = vmul.f32 1.442695, %v3012_v24 }
 0x541   :  { %v2192_v38 = vpop.eup %2191  ;;  %2197 = vpow2.f32 %v1391_v56 }
 0x542   :  { %v1298_v29 = vpop.xlane.xlu0 %1297  ;;  %v1427_v41 = vsel %vm1212_vm0, %v2192_v38, 0.0 }
 0x543   :  { %v2194_v59 = vpop.eup %2193  ;;  %v3018_v34 = vsub.f32 %v2834_v63, %v1298_v29  ;;  %1481 = vadd.xlane.f32.xlu0 %v1427_v41 }
 0x544   :  { %v1300_v51 = vpop.xlane.xlu1 %1299  ;;  %v1428_v47 = vsel %vm1212_vm0, %v2194_v59, 0.0 }
 0x545   :  { %v1393_v2 = vmul.f32 1.442695, %v3018_v34  ;;  %v3024_v6 = vsub.f32 %v2840_v3, %v1300_v51  ;;  %1483 = vadd.xlane.f32.xlu1 %v1428_v47 }
 0x547   :  { %2199 = vpow2.f32 %v1393_v2  ;;  %v1395_v4 = vmul.f32 1.442695, %v3024_v6 }
 0x549   :  { %v2196_v57 = vpop.eup %2195  ;;  %2201 = vpow2.f32 %v1395_v4 }
 0x54a   :  { %v1302_v48 = vpop.xlane.xlu0 %1301  ;;  %v1429_v63 = vsel %vm1212_vm0, %v2196_v57, 0.0 }
 0x54b   :  { %v2198_v7 = vpop.eup %2197  ;;  %v3030_v42 = vsub.f32 %v2846_v49, %v1302_v48  ;;  %1485 = vadd.xlane.f32.xlu0 %v1429_v63 }
 0x54c   :  { %v1304_v21 = vpop.xlane.xlu1 %1303  ;;  %v1430_v3 = vsel %vm1212_vm0, %v2198_v7, 0.0 }
 0x54d   :  { %v1397_v52 = vmul.f32 1.442695, %v3030_v42  ;;  %v3036_v15 = vsub.f32 %v2852_v53, %v1304_v21  ;;  %1487 = vadd.xlane.f32.xlu1 %v1430_v3 }
 0x54f   :  { %2203 = vpow2.f32 %v1397_v52  ;;  %v1399_v11 = vmul.f32 1.442695, %v3036_v15 }
 0x551   :  { %v2200_v26 = vpop.eup %2199  ;;  %2205 = vpow2.f32 %v1399_v11 }
 0x552   :  { %v1306_v62 = vpop.xlane.xlu0 %1305  ;;  %v1431_v49 = vsel %vm1212_vm0, %v2200_v26, 0.0 }
 0x553   :  { %v2202_v55 = vpop.eup %2201  ;;  %v3042_v19 = vsub.f32 %v2858_v25, %v1306_v62  ;;  %1489 = vadd.xlane.f32.xlu0 %v1431_v49 }
 0x554   :  { %v1308_v35 = vpop.xlane.xlu1 %1307  ;;  %v1432_v53 = vsel %vm1212_vm0, %v2202_v55, 0.0 }
 0x555   :  { %v1401_v27 = vmul.f32 1.442695, %v3042_v19  ;;  %v3048_v36 = vsub.f32 %v2864_v30, %v1308_v35  ;;  %1491 = vadd.xlane.f32.xlu1 %v1432_v53 }
 0x557   :  { %2207 = vpow2.f32 %v1401_v27  ;;  %v1403_v22 = vmul.f32 1.442695, %v3048_v36 }
 0x559   :  { %v2204_v40 = vpop.eup %2203  ;;  %2209 = vpow2.f32 %v1403_v22 }
 0x55a   :  { %v1433_v25 = vsel %vm1212_vm0, %v2204_v40, 0.0 }
 0x55b   :  { %v2206_v8 = vpop.eup %2205  ;;  %1493 = vadd.xlane.f32.xlu0 %v1433_v25 }
 0x55c   :  { %v1434_v28 = vsel %vm1212_vm0, %v2206_v8, 0.0 }
 0x55d   :  { %1495 = vadd.xlane.f32.xlu1 %v1434_v28 }
 0x561   :  { %v2208_v43 = vpop.eup %2207 }
 0x562   :  { %v1435_v30 = vsel %vm1212_vm0, %v2208_v43, 0.0 }
 0x563   :  { %v2210_v56 = vpop.eup %2209  ;;  %1497 = vadd.xlane.f32.xlu0 %v1435_v30 }
 0x564   :  { %v1436_v38 = vsel %vm1212_vm0, %v2210_v56, 0.0 }
 0x565   :  { %1499 = vadd.xlane.f32.xlu1 %v1436_v38 }
 0x578   :  { %v1438_v29 = vpop.xlane.xlu0 %1437 }
 0x579   :  { %2211 = vlog2.f32 %v1438_v29 }
 0x57c   :  { %v1440_v41 = vpop.xlane.xlu1 %1439 }
 0x57d   :  { %2213 = vlog2.f32 %v1440_v41 }
 0x580   :  { %v1442_v59 = vpop.xlane.xlu0 %1441 }
 0x581   :  { %2215 = vlog2.f32 %v1442_v59 }
 0x583   :  { %v2212_v51 = vpop.eup %2211 }
 0x584   :  { %v1502_v47 = vmul.f32 0.6931472, %v2212_v51  ;;  %v1444_v2 = vpop.xlane.xlu1 %1443 }
 0x585   :  { %2217 = vlog2.f32 %v1444_v2 }
 0x586   :  { %v1565_v4 = vsub.f32 %v2868_v32, %v1502_v47 }
 0x587   :  { %v2214_v57 = vpop.eup %2213 }
 0x588   :  { %1597 = vst [vmem:[%s3193_s6] sm:$0xff] %v1565_v4  ;;  %v1504_v12 = vmul.f32 0.6931472, %v2214_v57  ;;  %v1446_v48 = vpop.xlane.xlu0 %1445 }
 0x589   :  { %2219 = vlog2.f32 %v1446_v48 }
 0x58a   :  { %v1566_v63 = vsub.f32 %v2872_v37, %v1504_v12  ;;  %v1448_v7 = vpop.xlane.xlu1 %1447 }
 0x58b   :  { %v2216_v21 = vpop.eup %2215  ;;  %2221 = vlog2.f32 %v1448_v7 }
 0x58c   :  { %1598 = vst [vmem:[%s3193_s6 + $0x8] sm:$0xff] %v1566_v63  ;;  %v1506_v3 = vmul.f32 0.6931472, %v2216_v21 }
 0x58e   :  { %v1567_v32 = vsub.f32 %v2876_v46, %v1506_v3 }
 0x58f   :  { %v2218_v52 = vpop.eup %2217 }
 0x590   :  { %1599 = vst [vmem:[%s3193_s6 + $0x10] sm:$0xff] %v1567_v32  ;;  %v1508_v11 = vmul.f32 0.6931472, %v2218_v52  ;;  %v1450_v26 = vpop.xlane.xlu0 %1449 }
 0x591   :  { %2223 = vlog2.f32 %v1450_v26 }
 0x592   :  { %v1568_v37 = vsub.f32 %v2880_v23, %v1508_v11  ;;  %v1452_v62 = vpop.xlane.xlu1 %1451 }
 0x593   :  { %v2220_v49 = vpop.eup %2219  ;;  %2225 = vlog2.f32 %v1452_v62 }
 0x594   :  { %1600 = vst [vmem:[%s3193_s6 + $0x18] sm:$0xff] %v1568_v37  ;;  %v1510_v55 = vmul.f32 0.6931472, %v2220_v49 }
 0x595   :  { %v2222_v35 = vpop.eup %2221 }
 0x596   :  { %v1569_v46 = vsub.f32 %v2886_v61, %v1510_v55  ;;  %v1512_v53 = vmul.f32 0.6931472, %v2222_v35 }
 0x598   :  { %1601 = vst [vmem:[%s3193_s6 + $0x20] sm:$0xff] %v1569_v46  ;;  %v1570_v27 = vsub.f32 %v2890_v5, %v1512_v53  ;;  %v1454_v22 = vpop.xlane.xlu0 %1453 }
 0x599   :  { %2227 = vlog2.f32 %v1454_v22 }
 0x59a   :  { %1602 = vst [vmem:[%s3193_s6 + $0x28] sm:$0xff] %v1570_v27  ;;  %v1456_v23 = vpop.xlane.xlu1 %1455 }
 0x59b   :  { %v2224_v40 = vpop.eup %2223  ;;  %2229 = vlog2.f32 %v1456_v23 }
 0x59c   :  { %v1514_v25 = vmul.f32 0.6931472, %v2224_v40 }
 0x59d   :  { %v2226_v8 = vpop.eup %2225 }
 0x59e   :  { %v1571_v61 = vsub.f32 %v2898_v39, %v1514_v25  ;;  %v1516_v28 = vmul.f32 0.6931472, %v2226_v8 }
 0x5a0   :  { %1603 = vst [vmem:[%s3193_s6 + $0x30] sm:$0xff] %v1571_v61  ;;  %v1572_v5 = vsub.f32 %v2902_v14, %v1516_v28  ;;  %v1458_v43 = vpop.xlane.xlu0 %1457 }
 0x5a1   :  { %2231 = vlog2.f32 %v1458_v43 }
 0x5a2   :  { %1604 = vst [vmem:[%s3193_s6 + $0x38] sm:$0xff] %v1572_v5  ;;  %v1460_v30 = vpop.xlane.xlu1 %1459 }
 0x5a3   :  { %v2228_v56 = vpop.eup %2227  ;;  %2233 = vlog2.f32 %v1460_v30 }
 0x5a4   :  { %v1518_v38 = vmul.f32 0.6931472, %v2228_v56 }
 0x5a5   :  { %v2230_v29 = vpop.eup %2229 }
 0x5a6   :  { %v1573_v39 = vsub.f32 %v2910_v20, %v1518_v38  ;;  %v1520_v41 = vmul.f32 0.6931472, %v2230_v29 }
 0x5a8   :  { %1605 = vst [vmem:[%s3193_s6 + $0x40] sm:$0xff] %v1573_v39  ;;  %v1574_v14 = vsub.f32 %v2916_v33, %v1520_v41  ;;  %v1462_v59 = vpop.xlane.xlu0 %1461 }
 0x5a9   :  { %2235 = vlog2.f32 %v1462_v59 }
 0x5aa   :  { %1606 = vst [vmem:[%s3193_s6 + $0x48] sm:$0xff] %v1574_v14  ;;  %v1464_v51 = vpop.xlane.xlu1 %1463 }
 0x5ab   :  { %v2232_v47 = vpop.eup %2231  ;;  %2237 = vlog2.f32 %v1464_v51 }
 0x5ac   :  { %v1522_v2 = vmul.f32 0.6931472, %v2232_v47 }
 0x5ad   :  { %v2234_v4 = vpop.eup %2233 }
 0x5ae   :  { %v1575_v20 = vsub.f32 %v2922_v50, %v1522_v2  ;;  %v1524_v57 = vmul.f32 0.6931472, %v2234_v4 }
 0x5b0   :  { %1607 = vst [vmem:[%s3193_s6 + $0x50] sm:$0xff] %v1575_v20  ;;  %v1576_v33 = vsub.f32 %v2928_v60, %v1524_v57  ;;  %v1466_v12 = vpop.xlane.xlu0 %1465 }
 0x5b1   :  { %2239 = vlog2.f32 %v1466_v12 }
 0x5b2   :  { %1608 = vst [vmem:[%s3193_s6 + $0x58] sm:$0xff] %v1576_v33  ;;  %v1468_v48 = vpop.xlane.xlu1 %1467 }
 0x5b3   :  { %v2236_v63 = vpop.eup %2235  ;;  %2241 = vlog2.f32 %v1468_v48 }
 0x5b4   :  { %v1526_v7 = vmul.f32 0.6931472, %v2236_v63 }
 0x5b5   :  { %v2238_v21 = vpop.eup %2237 }
 0x5b6   :  { %v1577_v50 = vsub.f32 %v2934_v44, %v1526_v7  ;;  %v1528_v3 = vmul.f32 0.6931472, %v2238_v21 }
 0x5b8   :  { %1609 = vst [vmem:[%s3193_s6 + $0x60] sm:$0xff] %v1577_v50  ;;  %v1578_v60 = vsub.f32 %v2940_v13, %v1528_v3  ;;  %v1470_v32 = vpop.xlane.xlu0 %1469 }
 0x5b9   :  { %2243 = vlog2.f32 %v1470_v32 }
 0x5ba   :  { %1610 = vst [vmem:[%s3193_s6 + $0x68] sm:$0xff] %v1578_v60  ;;  %v1472_v52 = vpop.xlane.xlu1 %1471 }
 0x5bb   :  { %v2240_v11 = vpop.eup %2239  ;;  %2245 = vlog2.f32 %v1472_v52 }
 0x5bc   :  { %v1530_v26 = vmul.f32 0.6931472, %v2240_v11 }
 0x5bd   :  { %v2242_v37 = vpop.eup %2241 }
 0x5be   :  { %v1579_v44 = vsub.f32 %v2946_v10, %v1530_v26  ;;  %v1532_v62 = vmul.f32 0.6931472, %v2242_v37 }
 0x5c0   :  { %1611 = vst [vmem:[%s3193_s6 + $0x70] sm:$0xff] %v1579_v44  ;;  %v1580_v13 = vsub.f32 %v2952_v18, %v1532_v62  ;;  %v1474_v49 = vpop.xlane.xlu0 %1473 }
 0x5c1   :  { %2247 = vlog2.f32 %v1474_v49 }
 0x5c2   :  { %1612 = vst [vmem:[%s3193_s6 + $0x78] sm:$0xff] %v1580_v13  ;;  %v1476_v55 = vpop.xlane.xlu1 %1475 }
 0x5c3   :  { %v2244_v35 = vpop.eup %2243  ;;  %2249 = vlog2.f32 %v1476_v55 }
 0x5c4   :  { %v1534_v46 = vmul.f32 0.6931472, %v2244_v35 }
 0x5c5   :  { %v2246_v53 = vpop.eup %2245 }
 0x5c6   :  { %v1581_v10 = vsub.f32 %v2958_v31, %v1534_v46  ;;  %v1536_v27 = vmul.f32 0.6931472, %v2246_v53 }
 0x5c8   :  { %1613 = vst [vmem:[%s3193_s6 + $0x80] sm:$0xff] %v1581_v10  ;;  %v1582_v18 = vsub.f32 %v2964_v45, %v1536_v27  ;;  %v1478_v22 = vpop.xlane.xlu0 %1477 }
 0x5c9   :  { %2251 = vlog2.f32 %v1478_v22 }
 0x5ca   :  { %1614 = vst [vmem:[%s3193_s6 + $0x88] sm:$0xff] %v1582_v18  ;;  %v1480_v23 = vpop.xlane.xlu1 %1479 }
 0x5cb   :  { %v2248_v40 = vpop.eup %2247  ;;  %2253 = vlog2.f32 %v1480_v23 }
 0x5cc   :  { %v1538_v25 = vmul.f32 0.6931472, %v2248_v40 }
 0x5cd   :  { %v2250_v8 = vpop.eup %2249 }
 0x5ce   :  { %v1583_v31 = vsub.f32 %v2970_v58, %v1538_v25  ;;  %v1540_v61 = vmul.f32 0.6931472, %v2250_v8 }
 0x5d0   :  { %1615 = vst [vmem:[%s3193_s6 + $0x90] sm:$0xff] %v1583_v31  ;;  %v1584_v45 = vsub.f32 %v2976_v0, %v1540_v61  ;;  %v1482_v28 = vpop.xlane.xlu0 %1481 }
 0x5d1   :  { %2255 = vlog2.f32 %v1482_v28 }
 0x5d2   :  { %1616 = vst [vmem:[%s3193_s6 + $0x98] sm:$0xff] %v1584_v45  ;;  %v1484_v5 = vpop.xlane.xlu1 %1483 }
 0x5d3   :  { %v2252_v43 = vpop.eup %2251  ;;  %2257 = vlog2.f32 %v1484_v5 }
 0x5d4   :  { %v1542_v30 = vmul.f32 0.6931472, %v2252_v43 }
 0x5d5   :  { %v2254_v56 = vpop.eup %2253 }
 0x5d6   :  { %v1585_v58 = vsub.f32 %v2982_v9, %v1542_v30  ;;  %v1544_v38 = vmul.f32 0.6931472, %v2254_v56 }
 0x5d8   :  { %1617 = vst [vmem:[%s3193_s6 + $0xa0] sm:$0xff] %v1585_v58  ;;  %v1586_v0 = vsub.f32 %v2988_v54, %v1544_v38  ;;  %v1486_v29 = vpop.xlane.xlu0 %1485 }
 0x5d9   :  { %2259 = vlog2.f32 %v1486_v29 }
 0x5da   :  { %1618 = vst [vmem:[%s3193_s6 + $0xa8] sm:$0xff] %v1586_v0  ;;  %v1488_v39 = vpop.xlane.xlu1 %1487 }
 0x5db   :  { %v2256_v41 = vpop.eup %2255  ;;  %2261 = vlog2.f32 %v1488_v39 }
 0x5dc   :  { %v1546_v14 = vmul.f32 0.6931472, %v2256_v41 }
 0x5dd   :  { %v2258_v59 = vpop.eup %2257 }
 0x5de   :  { %v1587_v9 = vsub.f32 %v2994_v16, %v1546_v14  ;;  %v1548_v51 = vmul.f32 0.6931472, %v2258_v59 }
 0x5e0   :  { %1619 = vst [vmem:[%s3193_s6 + $0xb0] sm:$0xff] %v1587_v9  ;;  %v1588_v54 = vsub.f32 %v3000_v1, %v1548_v51  ;;  %v1490_v47 = vpop.xlane.xlu0 %1489 }
 0x5e1   :  { %2263 = vlog2.f32 %v1490_v47 }
 0x5e2   :  { %1620 = vst [vmem:[%s3193_s6 + $0xb8] sm:$0xff] %v1588_v54  ;;  %v1492_v2 = vpop.xlane.xlu1 %1491 }
 0x5e3   :  { %v2260_v4 = vpop.eup %2259  ;;  %2265 = vlog2.f32 %v1492_v2 }
 0x5e4   :  { %v1550_v20 = vmul.f32 0.6931472, %v2260_v4 }
 0x5e5   :  { %v2262_v57 = vpop.eup %2261 }
 0x5e6   :  { %v1589_v16 = vsub.f32 %v3006_v17, %v1550_v20  ;;  %v1552_v33 = vmul.f32 0.6931472, %v2262_v57 }
 0x5e8   :  { %1621 = vst [vmem:[%s3193_s6 + $0xc0] sm:$0xff] %v1589_v16  ;;  %v1590_v1 = vsub.f32 %v3012_v24, %v1552_v33  ;;  %v1494_v12 = vpop.xlane.xlu0 %1493 }
 0x5e9   :  { %2267 = vlog2.f32 %v1494_v12 }
 0x5ea   :  { %1622 = vst [vmem:[%s3193_s6 + $0xc8] sm:$0xff] %v1590_v1  ;;  %v1496_v48 = vpop.xlane.xlu1 %1495 }
 0x5eb   :  { %v2264_v63 = vpop.eup %2263  ;;  %2269 = vlog2.f32 %v1496_v48 }
 0x5ec   :  { %v1554_v7 = vmul.f32 0.6931472, %v2264_v63 }
 0x5ed   :  { %v2266_v21 = vpop.eup %2265 }
 0x5ee   :  { %v1591_v17 = vsub.f32 %v3018_v34, %v1554_v7  ;;  %v1556_v50 = vmul.f32 0.6931472, %v2266_v21 }
 0x5f0   :  { %1623 = vst [vmem:[%s3193_s6 + $0xd0] sm:$0xff] %v1591_v17  ;;  %v1592_v24 = vsub.f32 %v3024_v6, %v1556_v50  ;;  %v1498_v3 = vpop.xlane.xlu0 %1497 }
 0x5f1   :  { %2271 = vlog2.f32 %v1498_v3 }
 0x5f2   :  { %1624 = vst [vmem:[%s3193_s6 + $0xd8] sm:$0xff] %v1592_v24  ;;  %v1500_v60 = vpop.xlane.xlu1 %1499 }
 0x5f3   :  { %v2268_v32 = vpop.eup %2267  ;;  %2273 = vlog2.f32 %v1500_v60 }
 0x5f4   :  { %v1558_v52 = vmul.f32 0.6931472, %v2268_v32 }
 0x5f5   :  { %v2270_v11 = vpop.eup %2269 }
 0x5f6   :  { %v1593_v34 = vsub.f32 %v3030_v42, %v1558_v52  ;;  %v1560_v26 = vmul.f32 0.6931472, %v2270_v11 }
 0x5f8   :  { %1625 = vst [vmem:[%s3193_s6 + $0xe0] sm:$0xff] %v1593_v34  ;;  %v1594_v6 = vsub.f32 %v3036_v15, %v1560_v26 }
 0x5fa   :  { %1626 = vst [vmem:[%s3193_s6 + $0xe8] sm:$0xff] %v1594_v6 }
 0x5fb   :  { %v2272_v37 = vpop.eup %2271 }
 0x5fc   :  { %v1562_v44 = vmul.f32 0.6931472, %v2272_v37 }
 0x5fd   :  { %v2274_v62 = vpop.eup %2273 }
 0x5fe   :  { %v1595_v13 = vsub.f32 %v3042_v19, %v1562_v44  ;;  %v1564_v49 = vmul.f32 0.6931472, %v2274_v62 }
 0x600   :  { %1627 = vst [vmem:[%s3193_s6 + $0xf0] sm:$0xff] %v1595_v13  ;;  %v1596_v42 = vsub.f32 %v3048_v36, %v1564_v49 }
 0x602   :  { %1628 = vst [vmem:[%s3193_s6 + $0xf8] sm:$0xff] %v1596_v42 }

</bundles_post_ra>
